<compile_context>
chip_gen: v7x
topology: tpu7x:2x2x1
jax: 0.10.0
libtpu: 0.0.40
codegen_flags: <defaults>
</compile_context>

<pallas_src>
import functools

import jax
import jax.numpy as jnp
from jax.experimental import pallas as pl
from jax.experimental.pallas import tpu as pltpu  # noqa: F401  (TPU backend assumed)

# -------------------- model hyper-parameters (small, consistent w/ module) ---
D_MODEL = 32          # d_model
NHEAD = 4             # nhead
HEAD_DIM = D_MODEL // NHEAD
DIM_FF = 64           # dim_feedforward
CLIP = 3              # clipping_threshold
NUM_REL = 2 * CLIP + 1            # 7 relative-position buckets
REL_PAD = 8                       # buckets padded to 8 lanes (alignment; pad is zero)
EPS = 1e-5            # layer_norm_eps
BATCH = 2
SEQ = 8


def _layernorm(y, gamma, beta):
    mean = jnp.mean(y, axis=-1, keepdims=True)
    var = jnp.mean((y - mean) ** 2, axis=-1, keepdims=True)
    return (y - mean) * jax.lax.rsqrt(var + EPS) * gamma + beta


# ------------------------------- fused kernel --------------------------------
def _fused_layer_kernel(B, S, x_ref, wqkv_ref, wor_ref, w1_ref, w2_ref, aux_ref, o_ref):
    """Relative attention + residual + LN1 + FFN + residual + LN2, whole batch at once."""
    D, H, HD, EP = D_MODEL, NHEAD, HEAD_DIM, REL_PAD
    N = H * B                    # merged (head, batch) batch dim, n = h*B + b
    BS = B * S
    NS = N * S
    LOG2 = 3                     # S == EP == 8 (asserted in the wrapper)

    x = x_ref[...]                               # (B*S, D)
    aux = aux_ref[...]                           # (8, 128) packed vectors
    bqkv = aux[0:1, :]                           # (1, 128): bq | bk | bv | rel-K biases
    b1 = aux[1:2, 0:DIM_FF]
    bo = aux[2:3, 0:D]
    b2 = aux[3:4, 0:D]
    g1, be1 = aux[4:5, 0:D], aux[5:6, 0:D]
    g2, be2 = aux[6:7, 0:D], aux[7:8, 0:D]

    # ---- fused projection: one (B*S, D) @ (D, 3D + H*EP) MXU matmul -------------
    # columns: [Wq | Wk | Wv | per-head Wq_h @ emb_k^T]  (rel-K fold)
    qkv = jnp.dot(x, wqkv_ref[...], preferred_element_type=jnp.float32) + bqkv

    # ---- in-kernel relative-position bucket masks (iota compares, no operands) ---
    # onehot(e, q, k) = [clip(k - q, -CLIP, CLIP) + CLIP == e]
    def rel_mask(rows, rows_are_buckets):
        # (rows, S*EP) matrix; column c encodes (q' = c >> 3, j = c & 7)
        r_i = jax.lax.broadcasted_iota(jnp.int32, (rows, S * EP), 0)
        c_i = jax.lax.broadcasted_iota(jnp.int32, (rows, S * EP), 1)
        qp = jnp.right_shift(c_i, LOG2)
        j = jnp.bitwise_and(c_i, EP - 1)
        if rows_are_buckets:        # mk[e, q'*S + k]: rows are buckets e, j is k
            bucket, k = r_i, j
        else:                       # mv[k, q'*EP + e]: rows are keys k, j is e
            bucket, k = j, r_i
        hit = (jnp.clip(k - qp, -CLIP, CLIP) + CLIP) == bucket
        return jnp.where(hit, 1.0, 0.0).astype(jnp.float32)

    mk = rel_mask(EP, True)         # (EP, S*S)
    mv = rel_mask(S, False)         # (S, S*EP)

    # row r of the flattened head-batch tensors encodes (n = r >> 3, q = r & 7)
    r_i = jax.lax.broadcasted_iota(jnp.int32, (NS, S * EP), 0)
    c_i = jax.lax.broadcasted_iota(jnp.int32, (NS, S * EP), 1)
    qsel = jnp.where(jnp.bitwise_and(r_i, S - 1) == jnp.right_shift(c_i, LOG2),
                     1.0, 0.0).astype(jnp.float32)             # (NS, S*EP) q-block select
    rs_i = jax.lax.broadcasted_iota(jnp.int32, (S * EP, EP), 0)
    cs_i = jax.lax.broadcasted_iota(jnp.int32, (S * EP, EP), 1)
    sel = jnp.where(jnp.bitwise_and(rs_i, EP - 1) == cs_i,
                    1.0, 0.0).astype(jnp.float32)              # (S*EP, EP) block collapse

    def rel_contract(lhs, mat):
        # lhs (NS, 8) x mat (8, S*EP): per-row-q contraction with the bucket masks as
        # two tiny MXU matmuls (replaces the former 7-iteration VPU/XLU loops).
        big = jnp.dot(lhs, mat, preferred_element_type=jnp.float32)          # (NS, S*EP)
        return jnp.dot(big * qsel, sel, preferred_element_type=jnp.float32)  # (NS, EP)

    # ---- split heads: (B*S, .) -> (N, S, .) with n = h*B + b ---------------------
    def split_heads(base, width):
        return jnp.concatenate(
            [qkv[:, base + h * width: base + (h + 1) * width].reshape(B, S, width)
             for h in range(H)], axis=0)

    qh = split_heads(0, HD)                      # (N, S, HD)
    kh = split_heads(D, HD)
    vh = split_heads(2 * D, HD)
    thflat = jnp.concatenate(                    # rel-K bucket scores from the fused matmul
        [qkv[:, 3 * D + h * EP: 3 * D + (h + 1) * EP] for h in range(H)],
        axis=0)                                  # (NS, EP), row = n*S + q

    # ---- attention logits ---------------------------------------------------------
    a1 = jnp.einsum('nqd,nkd->nqk', qh, kh,
                    preferred_element_type=jnp.float32)                       # (N, S, S)
    a2 = rel_contract(thflat, mk).reshape(N, S, S)                            # Shaw rel-K
    logits = (a1 + a2) * (1.0 / (float(HD) ** 0.5))

    m = jnp.max(logits, axis=-1, keepdims=True)
    p = jnp.exp(logits - m)
    l = jnp.sum(p, axis=-1, keepdims=True)
    w = p / l                                    # exact softmax (correctness review)

    # ---- attention values ----------------------------------------------------------
    o1 = jnp.einsum('nqk,nkd->nqd', w, vh,
                    preferred_element_type=jnp.float32)                       # (N, S, HD)
    u = rel_contract(w.reshape(NS, S), mv)                                    # (NS, EP)

    # ---- merge heads + single matmul against [Wo ; emb_v @ Wo_h] (rel-V fold) -------
    o1flat = o1.reshape(NS, HD)
    o1m = jnp.concatenate([o1flat[h * BS:(h + 1) * BS, :] for h in range(H)], axis=-1)
    um = jnp.concatenate([u[h * BS:(h + 1) * BS, :] for h in range(H)], axis=-1)
    merged = jnp.concatenate([o1m, um], axis=-1)                   # (B*S, D + H*EP) = (16, 64)
    attn = jnp.dot(merged, wor_ref[...], preferred_element_type=jnp.float32) + bo

    # ---- residual + LN1 + FFN + residual + LN2 (dropouts = identity) ----------------
    y = _layernorm(x + attn, g1, be1)
    hdn = jnp.maximum(
        jnp.dot(y, w1_ref[...], preferred_element_type=jnp.float32) + b1, 0.0)
    f = jnp.dot(hdn, w2_ref[...], preferred_element_type=jnp.float32) + b2
    o_ref[...] = _layernorm(y + f, g2, be2)


# ------------------------------- wrapper --------------------------------------
def pack_params(params):
    """One-time repacking of PyTorch-layout params into the fused-kernel layout."""
    D, H, HD, E, EP = D_MODEL, NHEAD, HEAD_DIM, NUM_REL, REL_PAD
    hi = jax.lax.Precision.HIGHEST     # one-time, wrapper-side folds: keep them exact
    wq, wk, wv, wo = params['wq'], params['wk'], params['wv'], params['wo']
    bq, bk, bv = params['bq'], params['bk'], params['bv']
    emb_k, emb_v = params['emb_k'], params['emb_v']

    pad_c = lambda a: jnp.pad(a, ((0, 0), (0, EP - E)))   # (., E) -> (., EP)
    pad_r = lambda a: jnp.pad(a, ((0, EP - E), (0, 0)))   # (E, .) -> (EP, .)

    # rel-K fold: extra QKV columns project x straight onto per-head bucket scores
    wq_rel = jnp.concatenate(
        [pad_c(jnp.dot(wq[:, h * HD:(h + 1) * HD], emb_k.T, precision=hi))
         for h in range(H)], axis=1)                                   # (D, H*EP)
    bq_rel = jnp.concatenate(
        [pad_c(jnp.dot(bq[:, h * HD:(h + 1) * HD], emb_k.T, precision=hi))
         for h in range(H)], axis=1)                                   # (1, H*EP)
    wqkv = jnp.concatenate([wq, wk, wv, wq_rel], axis=1)               # (32, 128)
    bqkv = jnp.concatenate([bq, bk, bv, bq_rel], axis=1)               # (1, 128)

    # rel-V fold: emb_v pushed through the matching Wo row block
    w_relv = jnp.concatenate(
        [pad_r(jnp.dot(emb_v, wo[h * HD:(h + 1) * HD, :], precision=hi))
         for h in range(H)], axis=0)                                   # (H*EP, D)
    wor = jnp.concatenate([wo, w_relv], axis=0)                        # (64, 32)

    # all small vectors in one (8, 128) aux slab -> one DMA descriptor
    row = lambda v: jnp.pad(v, ((0, 0), (0, 128 - v.shape[1])))
    aux = jnp.concatenate(
        [row(bqkv), row(params['b1']), row(params['bo']), row(params['b2']),
         row(params['ln1_g']), row(params['ln1_b']),
         row(params['ln2_g']), row(params['ln2_b'])], axis=0)          # (8, 128)

    return {'wqkv': wqkv, 'wor': wor, 'w1': params['w1'], 'w2': params['w2'], 'aux': aux}


def relative_transformer_encoder_layer(x, packed):
    B, S, D = x.shape
    # in-kernel bucket masks assume S == REL_PAD == 8 (single power-of-two block width)
    assert S == REL_PAD and D == D_MODEL
    kernel = functools.partial(_fused_layer_kernel, B, S)
    out2d = pl.pallas_call(
        kernel,
        out_shape=jax.ShapeDtypeStruct((B * S, D), jnp.float32),
        # gridless: whole (tiny) problem + weights resident in VMEM in one step.
    )(x.reshape(B * S, D), packed['wqkv'], packed['wor'],
      packed['w1'], packed['w2'], packed['aux'])
    return out2d.reshape(B, S, D)


# ---------------------- pure-JAX reference (for verification) ----------------
def reference(x, params):
    B, S, D = x.shape
    rng = jnp.arange(S)
    idx = jnp.clip(rng[None, :] - rng[:, None], -CLIP, CLIP) + CLIP
    relk = params['emb_k'][idx]
    relv = params['emb_v'][idx]

    q = x @ params['wq'] + params['bq'][0]
    k = x @ params['wk'] + params['bk'][0]
    v = x @ params['wv'] + params['bv'][0]
    qr = q.reshape(B, S, NHEAD, HEAD_DIM).transpose(0, 2, 1, 3)
    kr = k.reshape(B, S, NHEAD, HEAD_DIM).transpose(0, 2, 1, 3)
    vr = v.reshape(B, S, NHEAD, HEAD_DIM).transpose(0, 2, 1, 3)

    a1 = jnp.einsum('bhqd,bhkd->bhqk', qr, kr)
    a2 = jnp.einsum('bhqd,qkd->bhqk', qr, relk)
    w = jax.nn.softmax((a1 + a2) / jnp.sqrt(jnp.float32(HEAD_DIM)), axis=-1)
    o1 = jnp.einsum('bhqk,bhkd->bhqd', w, vr)
    o2 = jnp.einsum('bhqk,qkd->bhqd', w, relv)
    attn = (o1 + o2).transpose(0, 2, 1, 3).reshape(B, S, D)
    attn = attn @ params['wo'] + params['bo'][0]

    def ln(y, g, b):
        m = y.mean(-1, keepdims=True)
        var = ((y - m) ** 2).mean(-1, keepdims=True)
        return (y - m) / jnp.sqrt(var + EPS) * g[0] + b[0]

    y = ln(x + attn, params['ln1_g'], params['ln1_b'])
    h = jnp.maximum(y @ params['w1'] + params['b1'][0], 0.0)
    f = h @ params['w2'] + params['b2'][0]
    return ln(y + f, params['ln2_g'], params['ln2_b'])


# --------------------------------- main ---------------------------------------
if __name__ == "__main__":
    key = jax.random.PRNGKey(0)
    ks = jax.random.split(key, 16)

    def w(k, shape, scale=0.1):
        return (scale * jax.random.normal(k, shape)).astype(jnp.float32)

    params = {
        'wq': w(ks[0], (D_MODEL, D_MODEL)), 'bq': w(ks[1], (1, D_MODEL)),
        'wk': w(ks[2], (D_MODEL, D_MODEL)), 'bk': w(ks[3], (1, D_MODEL)),
        'wv': w(ks[4], (D_MODEL, D_MODEL)), 'bv': w(ks[5], (1, D_MODEL)),
        'wo': w(ks[6], (D_MODEL, D_MODEL)), 'bo': w(ks[7], (1, D_MODEL)),
        'emb_k': w(ks[8], (NUM_REL, HEAD_DIM)),
        'emb_v': w(ks[9], (NUM_REL, HEAD_DIM)),
        'w1': w(ks[10], (D_MODEL, DIM_FF)), 'b1': w(ks[11], (1, DIM_FF)),
        'w2': w(ks[12], (DIM_FF, D_MODEL)), 'b2': w(ks[13], (1, D_MODEL)),
        'ln1_g': jnp.ones((1, D_MODEL), jnp.float32),
        'ln1_b': jnp.zeros((1, D_MODEL), jnp.float32),
        'ln2_g': jnp.ones((1, D_MODEL), jnp.float32),
        'ln2_b': jnp.zeros((1, D_MODEL), jnp.float32),
    }

    src = jax.random.normal(ks[14], (BATCH, SEQ, D_MODEL), dtype=jnp.float32)

    packed = pack_params(params)
    out = relative_transformer_encoder_layer(src, packed)
    out = jax.block_until_ready(out)

    ref = reference(src, params)
    assert out.shape == (BATCH, SEQ, D_MODEL)
    # kernel math is exact (no approx reciprocal); the tolerance only covers possible
    # differences in f32-matmul emulation between XLA (reference) and Mosaic (kernel).
    assert jnp.allclose(out, ref, atol=2e-3, rtol=2e-3), (
        f"max abs err {jnp.max(jnp.abs(out - ref))}")

    print("KERNEL_OK")
</pallas_src>

<mosaic_0001>
module attributes {stable_mosaic.version = 11 : i64} {
  func.func @_fused_layer_kernel(%arg0: memref<16x32xf32, #tpu.memory_space<vmem>>, %arg1: memref<32x128xf32, #tpu.memory_space<vmem>>, %arg2: memref<64x32xf32, #tpu.memory_space<vmem>>, %arg3: memref<32x64xf32, #tpu.memory_space<vmem>>, %arg4: memref<64x32xf32, #tpu.memory_space<vmem>>, %arg5: memref<8x128xf32, #tpu.memory_space<vmem>>, %arg6: memref<16x32xf32, #tpu.memory_space<vmem>>) attributes {dimension_semantics = [], scalar_prefetch = 0 : i64, scratch_operands = 0 : i64, tpu.core_type = #tpu.core_type<tc>} {
    %c0 = arith.constant 0 : index
    %c0_0 = arith.constant 0 : index
    %0 = vector.load %arg0[%c0, %c0_0] : memref<16x32xf32, #tpu.memory_space<vmem>>, vector<16x32xf32>
    %c0_1 = arith.constant 0 : index
    %c0_2 = arith.constant 0 : index
    %1 = vector.load %arg5[%c0_1, %c0_2] : memref<8x128xf32, #tpu.memory_space<vmem>>, vector<8x128xf32>
    %2 = vector.extract_strided_slice %1 {offsets = [0, 0], sizes = [1, 128], strides = [1, 1]} : vector<8x128xf32> to vector<1x128xf32>
    %3 = vector.extract_strided_slice %1 {offsets = [1, 0], sizes = [1, 64], strides = [1, 1]} : vector<8x128xf32> to vector<1x64xf32>
    %4 = vector.extract_strided_slice %1 {offsets = [2, 0], sizes = [1, 32], strides = [1, 1]} : vector<8x128xf32> to vector<1x32xf32>
    %5 = vector.extract_strided_slice %1 {offsets = [3, 0], sizes = [1, 32], strides = [1, 1]} : vector<8x128xf32> to vector<1x32xf32>
    %6 = vector.extract_strided_slice %1 {offsets = [4, 0], sizes = [1, 32], strides = [1, 1]} : vector<8x128xf32> to vector<1x32xf32>
    %7 = vector.extract_strided_slice %1 {offsets = [5, 0], sizes = [1, 32], strides = [1, 1]} : vector<8x128xf32> to vector<1x32xf32>
    %8 = vector.extract_strided_slice %1 {offsets = [6, 0], sizes = [1, 32], strides = [1, 1]} : vector<8x128xf32> to vector<1x32xf32>
    %9 = vector.extract_strided_slice %1 {offsets = [7, 0], sizes = [1, 32], strides = [1, 1]} : vector<8x128xf32> to vector<1x32xf32>
    %c0_3 = arith.constant 0 : index
    %c0_4 = arith.constant 0 : index
    %10 = vector.load %arg1[%c0_3, %c0_4] : memref<32x128xf32, #tpu.memory_space<vmem>>, vector<32x128xf32>
    %cst = arith.constant dense<0.000000e+00> : vector<16x128xf32>
    %11 = tpu.matmul %0, %10, %cst {dimension_numbers = #tpu.dot_dimension_numbers<[1], [0], [0], [1], [0, 0, 1, 1], [], []>} : vector<16x32xf32>, vector<32x128xf32>, vector<16x128xf32> -> vector<16x128xf32>
    %12 = vector.broadcast %2 : vector<1x128xf32> to vector<16x128xf32>
    %13 = arith.addf %11, %12 : vector<16x128xf32>
    %14 = tpu.iota {dimensions = array<i32: 0>} : vector<8x64xi32>
    %15 = tpu.iota {dimensions = array<i32: 1>} : vector<8x64xi32>
    %c3_i32 = arith.constant 3 : i32
    %16 = vector.broadcast %c3_i32 : i32 to vector<8x64xi32>
    %17 = arith.shrsi %15, %16 : vector<8x64xi32>
    %c7_i32 = arith.constant 7 : i32
    %18 = vector.broadcast %c7_i32 : i32 to vector<8x64xi32>
    %19 = arith.andi %15, %18 : vector<8x64xi32>
    %20 = arith.subi %19, %17 : vector<8x64xi32>
    %c-3_i32 = arith.constant -3 : i32
    %c3_i32_5 = arith.constant 3 : i32
    %21 = vector.broadcast %c-3_i32 : i32 to vector<8x64xi32>
    %22 = arith.maxsi %21, %20 : vector<8x64xi32>
    %23 = vector.broadcast %c3_i32_5 : i32 to vector<8x64xi32>
    %24 = arith.minsi %23, %22 : vector<8x64xi32>
    %c3_i32_6 = arith.constant 3 : i32
    %25 = vector.broadcast %c3_i32_6 : i32 to vector<8x64xi32>
    %26 = arith.addi %24, %25 : vector<8x64xi32>
    %27 = arith.cmpi eq, %26, %14 : vector<8x64xi32>
    %cst_7 = arith.constant 1.000000e+00 : f32
    %cst_8 = arith.constant 0.000000e+00 : f32
    %28 = vector.broadcast %cst_7 : f32 to vector<8x64xf32>
    %29 = vector.broadcast %cst_8 : f32 to vector<8x64xf32>
    %30 = arith.select %27, %28, %29 : vector<8x64xi1>, vector<8x64xf32>
    %31 = tpu.iota {dimensions = array<i32: 0>} : vector<8x64xi32>
    %32 = tpu.iota {dimensions = array<i32: 1>} : vector<8x64xi32>
    %c3_i32_9 = arith.constant 3 : i32
    %33 = vector.broadcast %c3_i32_9 : i32 to vector<8x64xi32>
    %34 = arith.shrsi %32, %33 : vector<8x64xi32>
    %c7_i32_10 = arith.constant 7 : i32
    %35 = vector.broadcast %c7_i32_10 : i32 to vector<8x64xi32>
    %36 = arith.andi %32, %35 : vector<8x64xi32>
    %37 = arith.subi %31, %34 : vector<8x64xi32>
    %c-3_i32_11 = arith.constant -3 : i32
    %c3_i32_12 = arith.constant 3 : i32
    %38 = vector.broadcast %c-3_i32_11 : i32 to vector<8x64xi32>
    %39 = arith.maxsi %38, %37 : vector<8x64xi32>
    %40 = vector.broadcast %c3_i32_12 : i32 to vector<8x64xi32>
    %41 = arith.minsi %40, %39 : vector<8x64xi32>
    %c3_i32_13 = arith.constant 3 : i32
    %42 = vector.broadcast %c3_i32_13 : i32 to vector<8x64xi32>
    %43 = arith.addi %41, %42 : vector<8x64xi32>
    %44 = arith.cmpi eq, %43, %36 : vector<8x64xi32>
    %cst_14 = arith.constant 1.000000e+00 : f32
    %cst_15 = arith.constant 0.000000e+00 : f32
    %45 = vector.broadcast %cst_14 : f32 to vector<8x64xf32>
    %46 = vector.broadcast %cst_15 : f32 to vector<8x64xf32>
    %47 = arith.select %44, %45, %46 : vector<8x64xi1>, vector<8x64xf32>
    %48 = tpu.iota {dimensions = array<i32: 0>} : vector<64x64xi32>
    %49 = tpu.iota {dimensions = array<i32: 1>} : vector<64x64xi32>
    %c7_i32_16 = arith.constant 7 : i32
    %50 = vector.broadcast %c7_i32_16 : i32 to vector<64x64xi32>
    %51 = arith.andi %48, %50 : vector<64x64xi32>
    %c3_i32_17 = arith.constant 3 : i32
    %52 = vector.broadcast %c3_i32_17 : i32 to vector<64x64xi32>
    %53 = arith.shrsi %49, %52 : vector<64x64xi32>
    %54 = arith.cmpi eq, %51, %53 : vector<64x64xi32>
    %cst_18 = arith.constant 1.000000e+00 : f32
    %cst_19 = arith.constant 0.000000e+00 : f32
    %55 = vector.broadcast %cst_18 : f32 to vector<64x64xf32>
    %56 = vector.broadcast %cst_19 : f32 to vector<64x64xf32>
    %57 = arith.select %54, %55, %56 : vector<64x64xi1>, vector<64x64xf32>
    %58 = tpu.iota {dimensions = array<i32: 0>} : vector<64x8xi32>
    %59 = tpu.iota {dimensions = array<i32: 1>} : vector<64x8xi32>
    %c7_i32_20 = arith.constant 7 : i32
    %60 = vector.broadcast %c7_i32_20 : i32 to vector<64x8xi32>
    %61 = arith.andi %58, %60 : vector<64x8xi32>
    %62 = arith.cmpi eq, %61, %59 : vector<64x8xi32>
    %cst_21 = arith.constant 1.000000e+00 : f32
    %cst_22 = arith.constant 0.000000e+00 : f32
    %63 = vector.broadcast %cst_21 : f32 to vector<64x8xf32>
    %64 = vector.broadcast %cst_22 : f32 to vector<64x8xf32>
    %65 = arith.select %62, %63, %64 : vector<64x8xi1>, vector<64x8xf32>
    %66 = vector.extract_strided_slice %13 {offsets = [0, 0], sizes = [16, 8], strides = [1, 1]} : vector<16x128xf32> to vector<16x8xf32>
    %67 = vector.shape_cast %66 : vector<16x8xf32> to vector<2x8x8xf32>
    %68 = vector.extract_strided_slice %13 {offsets = [0, 8], sizes = [16, 8], strides = [1, 1]} : vector<16x128xf32> to vector<16x8xf32>
    %69 = vector.shape_cast %68 : vector<16x8xf32> to vector<2x8x8xf32>
    %70 = vector.extract_strided_slice %13 {offsets = [0, 16], sizes = [16, 8], strides = [1, 1]} : vector<16x128xf32> to vector<16x8xf32>
    %71 = vector.shape_cast %70 : vector<16x8xf32> to vector<2x8x8xf32>
    %72 = vector.extract_strided_slice %13 {offsets = [0, 24], sizes = [16, 8], strides = [1, 1]} : vector<16x128xf32> to vector<16x8xf32>
    %73 = vector.shape_cast %72 : vector<16x8xf32> to vector<2x8x8xf32>
    %74 = tpu.concatenate %67, %69, %71, %73 in 0 : vector<2x8x8xf32>, vector<2x8x8xf32>, vector<2x8x8xf32>, vector<2x8x8xf32> -> vector<8x8x8xf32>
    %75 = vector.extract_strided_slice %13 {offsets = [0, 32], sizes = [16, 8], strides = [1, 1]} : vector<16x128xf32> to vector<16x8xf32>
    %76 = vector.shape_cast %75 : vector<16x8xf32> to vector<2x8x8xf32>
    %77 = vector.extract_strided_slice %13 {offsets = [0, 40], sizes = [16, 8], strides = [1, 1]} : vector<16x128xf32> to vector<16x8xf32>
    %78 = vector.shape_cast %77 : vector<16x8xf32> to vector<2x8x8xf32>
    %79 = vector.extract_strided_slice %13 {offsets = [0, 48], sizes = [16, 8], strides = [1, 1]} : vector<16x128xf32> to vector<16x8xf32>
    %80 = vector.shape_cast %79 : vector<16x8xf32> to vector<2x8x8xf32>
    %81 = vector.extract_strided_slice %13 {offsets = [0, 56], sizes = [16, 8], strides = [1, 1]} : vector<16x128xf32> to vector<16x8xf32>
    %82 = vector.shape_cast %81 : vector<16x8xf32> to vector<2x8x8xf32>
    %83 = tpu.concatenate %76, %78, %80, %82 in 0 : vector<2x8x8xf32>, vector<2x8x8xf32>, vector<2x8x8xf32>, vector<2x8x8xf32> -> vector<8x8x8xf32>
    %84 = vector.extract_strided_slice %13 {offsets = [0, 64], sizes = [16, 8], strides = [1, 1]} : vector<16x128xf32> to vector<16x8xf32>
    %85 = vector.shape_cast %84 : vector<16x8xf32> to vector<2x8x8xf32>
    %86 = vector.extract_strided_slice %13 {offsets = [0, 72], sizes = [16, 8], strides = [1, 1]} : vector<16x128xf32> to vector<16x8xf32>
    %87 = vector.shape_cast %86 : vector<16x8xf32> to vector<2x8x8xf32>
    %88 = vector.extract_strided_slice %13 {offsets = [0, 80], sizes = [16, 8], strides = [1, 1]} : vector<16x128xf32> to vector<16x8xf32>
    %89 = vector.shape_cast %88 : vector<16x8xf32> to vector<2x8x8xf32>
    %90 = vector.extract_strided_slice %13 {offsets = [0, 88], sizes = [16, 8], strides = [1, 1]} : vector<16x128xf32> to vector<16x8xf32>
    %91 = vector.shape_cast %90 : vector<16x8xf32> to vector<2x8x8xf32>
    %92 = tpu.concatenate %85, %87, %89, %91 in 0 : vector<2x8x8xf32>, vector<2x8x8xf32>, vector<2x8x8xf32>, vector<2x8x8xf32> -> vector<8x8x8xf32>
    %93 = vector.extract_strided_slice %13 {offsets = [0, 96], sizes = [16, 8], strides = [1, 1]} : vector<16x128xf32> to vector<16x8xf32>
    %94 = vector.extract_strided_slice %13 {offsets = [0, 104], sizes = [16, 8], strides = [1, 1]} : vector<16x128xf32> to vector<16x8xf32>
    %95 = vector.extract_strided_slice %13 {offsets = [0, 112], sizes = [16, 8], strides = [1, 1]} : vector<16x128xf32> to vector<16x8xf32>
    %96 = vector.extract_strided_slice %13 {offsets = [0, 120], sizes = [16, 8], strides = [1, 1]} : vector<16x128xf32> to vector<16x8xf32>
    %97 = tpu.concatenate %93, %94, %95, %96 in 0 : vector<16x8xf32>, vector<16x8xf32>, vector<16x8xf32>, vector<16x8xf32> -> vector<64x8xf32>
    "tpu.trace_start"() <{level = 10 : i32, message = "nqd,nkd->nqk"}> : () -> ()
    %cst_23 = arith.constant dense<0.000000e+00> : vector<8x8x8xf32>
    %98 = tpu.matmul %74, %83, %cst_23 {dimension_numbers = #tpu.dot_dimension_numbers<[2], [2], [1], [1], [0, 0, 0, 1, 1, 1], [0], [0]>} : vector<8x8x8xf32>, vector<8x8x8xf32>, vector<8x8x8xf32> -> vector<8x8x8xf32>
    "tpu.trace_stop"() : () -> ()
    %cst_24 = arith.constant dense<0.000000e+00> : vector<64x64xf32>
    %99 = tpu.matmul %97, %30, %cst_24 {dimension_numbers = #tpu.dot_dimension_numbers<[1], [0], [0], [1], [0, 0, 1, 1], [], []>} : vector<64x8xf32>, vector<8x64xf32>, vector<64x64xf32> -> vector<64x64xf32>
    %100 = arith.mulf %99, %57 : vector<64x64xf32>
    %cst_25 = arith.constant dense<0.000000e+00> : vector<64x8xf32>
    %101 = tpu.matmul %100, %65, %cst_25 {dimension_numbers = #tpu.dot_dimension_numbers<[1], [0], [0], [1], [0, 0, 1, 1], [], []>} : vector<64x64xf32>, vector<64x8xf32>, vector<64x8xf32> -> vector<64x8xf32>
    %102 = vector.shape_cast %101 : vector<64x8xf32> to vector<8x8x8xf32>
    %103 = arith.addf %98, %102 : vector<8x8x8xf32>
    %cst_26 = arith.constant 0.353553385 : f32
    %104 = vector.broadcast %cst_26 : f32 to vector<8x8x8xf32>
    %105 = arith.mulf %103, %104 : vector<8x8x8xf32>
    %cst_27 = arith.constant dense<0xFF800000> : vector<8x8xf32>
    %106 = vector.multi_reduction <maximumf>, %105, %cst_27 [2] : vector<8x8x8xf32> to vector<8x8xf32>
    %107 = vector.shape_cast %106 : vector<8x8xf32> to vector<8x8x1xf32>
    %108 = vector.broadcast %107 : vector<8x8x1xf32> to vector<8x8x8xf32>
    %109 = arith.subf %105, %108 : vector<8x8x8xf32>
    %110 = math.exp %109 : vector<8x8x8xf32>
    %cst_28 = arith.constant dense<0.000000e+00> : vector<8x8xf32>
    %111 = vector.multi_reduction <add>, %110, %cst_28 [2] : vector<8x8x8xf32> to vector<8x8xf32>
    %112 = vector.shape_cast %111 : vector<8x8xf32> to vector<8x8x1xf32>
    %113 = vector.broadcast %112 : vector<8x8x1xf32> to vector<8x8x8xf32>
    %114 = arith.divf %110, %113 : vector<8x8x8xf32>
    "tpu.trace_start"() <{level = 10 : i32, message = "nqk,nkd->nqd"}> : () -> ()
    %cst_29 = arith.constant dense<0.000000e+00> : vector<8x8x8xf32>
    %115 = tpu.matmul %114, %92, %cst_29 {dimension_numbers = #tpu.dot_dimension_numbers<[2], [1], [1], [2], [0, 0, 0, 1, 1, 2], [0], [0]>} : vector<8x8x8xf32>, vector<8x8x8xf32>, vector<8x8x8xf32> -> vector<8x8x8xf32>
    "tpu.trace_stop"() : () -> ()
    %116 = vector.shape_cast %114 : vector<8x8x8xf32> to vector<64x8xf32>
    %cst_30 = arith.constant dense<0.000000e+00> : vector<64x64xf32>
    %117 = tpu.matmul %116, %47, %cst_30 {dimension_numbers = #tpu.dot_dimension_numbers<[1], [0], [0], [1], [0, 0, 1, 1], [], []>} : vector<64x8xf32>, vector<8x64xf32>, vector<64x64xf32> -> vector<64x64xf32>
    %118 = arith.mulf %117, %57 : vector<64x64xf32>
    %cst_31 = arith.constant dense<0.000000e+00> : vector<64x8xf32>
    %119 = tpu.matmul %118, %65, %cst_31 {dimension_numbers = #tpu.dot_dimension_numbers<[1], [0], [0], [1], [0, 0, 1, 1], [], []>} : vector<64x64xf32>, vector<64x8xf32>, vector<64x8xf32> -> vector<64x8xf32>
    %120 = vector.shape_cast %115 : vector<8x8x8xf32> to vector<64x8xf32>
    %121 = vector.extract_strided_slice %120 {offsets = [0, 0], sizes = [16, 8], strides = [1, 1]} : vector<64x8xf32> to vector<16x8xf32>
    %122 = vector.extract_strided_slice %120 {offsets = [16, 0], sizes = [16, 8], strides = [1, 1]} : vector<64x8xf32> to vector<16x8xf32>
    %123 = vector.extract_strided_slice %120 {offsets = [32, 0], sizes = [16, 8], strides = [1, 1]} : vector<64x8xf32> to vector<16x8xf32>
    %124 = vector.extract_strided_slice %120 {offsets = [48, 0], sizes = [16, 8], strides = [1, 1]} : vector<64x8xf32> to vector<16x8xf32>
    %125 = tpu.concatenate %121, %122, %123, %124 in 1 : vector<16x8xf32>, vector<16x8xf32>, vector<16x8xf32>, vector<16x8xf32> -> vector<16x32xf32>
    %126 = vector.extract_strided_slice %119 {offsets = [0, 0], sizes = [16, 8], strides = [1, 1]} : vector<64x8xf32> to vector<16x8xf32>
    %127 = vector.extract_strided_slice %119 {offsets = [16, 0], sizes = [16, 8], strides = [1, 1]} : vector<64x8xf32> to vector<16x8xf32>
    %128 = vector.extract_strided_slice %119 {offsets = [32, 0], sizes = [16, 8], strides = [1, 1]} : vector<64x8xf32> to vector<16x8xf32>
    %129 = vector.extract_strided_slice %119 {offsets = [48, 0], sizes = [16, 8], strides = [1, 1]} : vector<64x8xf32> to vector<16x8xf32>
    %130 = tpu.concatenate %126, %127, %128, %129 in 1 : vector<16x8xf32>, vector<16x8xf32>, vector<16x8xf32>, vector<16x8xf32> -> vector<16x32xf32>
    %131 = tpu.concatenate %125, %130 in 1 : vector<16x32xf32>, vector<16x32xf32> -> vector<16x64xf32>
    %c0_32 = arith.constant 0 : index
    %c0_33 = arith.constant 0 : index
    %132 = vector.load %arg2[%c0_32, %c0_33] : memref<64x32xf32, #tpu.memory_space<vmem>>, vector<64x32xf32>
    %cst_34 = arith.constant dense<0.000000e+00> : vector<16x32xf32>
    %133 = tpu.matmul %131, %132, %cst_34 {dimension_numbers = #tpu.dot_dimension_numbers<[1], [0], [0], [1], [0, 0, 1, 1], [], []>} : vector<16x64xf32>, vector<64x32xf32>, vector<16x32xf32> -> vector<16x32xf32>
    %134 = vector.broadcast %4 : vector<1x32xf32> to vector<16x32xf32>
    %135 = arith.addf %133, %134 : vector<16x32xf32>
    %136 = arith.addf %0, %135 : vector<16x32xf32>
    %cst_35 = arith.constant dense<0.000000e+00> : vector<16xf32>
    %137 = vector.multi_reduction <add>, %136, %cst_35 [1] : vector<16x32xf32> to vector<16xf32>
    %138 = vector.shape_cast %137 : vector<16xf32> to vector<16x1xf32>
    %cst_36 = arith.constant 3.200000e+01 : f32
    %139 = vector.broadcast %cst_36 : f32 to vector<16x1xf32>
    %140 = arith.divf %138, %139 : vector<16x1xf32>
    %141 = vector.broadcast %140 : vector<16x1xf32> to vector<16x32xf32>
    %142 = arith.subf %136, %141 : vector<16x32xf32>
    %143 = arith.mulf %142, %142 : vector<16x32xf32>
    %cst_37 = arith.constant dense<0.000000e+00> : vector<16xf32>
    %144 = vector.multi_reduction <add>, %143, %cst_37 [1] : vector<16x32xf32> to vector<16xf32>
    %145 = vector.shape_cast %144 : vector<16xf32> to vector<16x1xf32>
    %cst_38 = arith.constant 3.200000e+01 : f32
    %146 = vector.broadcast %cst_38 : f32 to vector<16x1xf32>
    %147 = arith.divf %145, %146 : vector<16x1xf32>
    %148 = vector.broadcast %140 : vector<16x1xf32> to vector<16x32xf32>
    %149 = arith.subf %136, %148 : vector<16x32xf32>
    %cst_39 = arith.constant 9.99999974E-6 : f32
    %150 = vector.broadcast %cst_39 : f32 to vector<16x1xf32>
    %151 = arith.addf %147, %150 : vector<16x1xf32>
    %152 = math.rsqrt %151 : vector<16x1xf32>
    %153 = vector.broadcast %152 : vector<16x1xf32> to vector<16x32xf32>
    %154 = arith.mulf %149, %153 : vector<16x32xf32>
    %155 = vector.broadcast %6 : vector<1x32xf32> to vector<16x32xf32>
    %156 = arith.mulf %154, %155 : vector<16x32xf32>
    %157 = vector.broadcast %7 : vector<1x32xf32> to vector<16x32xf32>
    %158 = arith.addf %156, %157 : vector<16x32xf32>
    %c0_40 = arith.constant 0 : index
    %c0_41 = arith.constant 0 : index
    %159 = vector.load %arg3[%c0_40, %c0_41] : memref<32x64xf32, #tpu.memory_space<vmem>>, vector<32x64xf32>
    %cst_42 = arith.constant dense<0.000000e+00> : vector<16x64xf32>
    %160 = tpu.matmul %158, %159, %cst_42 {dimension_numbers = #tpu.dot_dimension_numbers<[1], [0], [0], [1], [0, 0, 1, 1], [], []>} : vector<16x32xf32>, vector<32x64xf32>, vector<16x64xf32> -> vector<16x64xf32>
    %161 = vector.broadcast %3 : vector<1x64xf32> to vector<16x64xf32>
    %162 = arith.addf %160, %161 : vector<16x64xf32>
    %cst_43 = arith.constant 0.000000e+00 : f32
    %163 = vector.broadcast %cst_43 : f32 to vector<16x64xf32>
    %164 = arith.maximumf %162, %163 : vector<16x64xf32>
    %c0_44 = arith.constant 0 : index
    %c0_45 = arith.constant 0 : index
    %165 = vector.load %arg4[%c0_44, %c0_45] : memref<64x32xf32, #tpu.memory_space<vmem>>, vector<64x32xf32>
    %cst_46 = arith.constant dense<0.000000e+00> : vector<16x32xf32>
    %166 = tpu.matmul %164, %165, %cst_46 {dimension_numbers = #tpu.dot_dimension_numbers<[1], [0], [0], [1], [0, 0, 1, 1], [], []>} : vector<16x64xf32>, vector<64x32xf32>, vector<16x32xf32> -> vector<16x32xf32>
    %167 = vector.broadcast %5 : vector<1x32xf32> to vector<16x32xf32>
    %168 = arith.addf %166, %167 : vector<16x32xf32>
    %169 = arith.addf %158, %168 : vector<16x32xf32>
    %cst_47 = arith.constant dense<0.000000e+00> : vector<16xf32>
    %170 = vector.multi_reduction <add>, %169, %cst_47 [1] : vector<16x32xf32> to vector<16xf32>
    %171 = vector.shape_cast %170 : vector<16xf32> to vector<16x1xf32>
    %cst_48 = arith.constant 3.200000e+01 : f32
    %172 = vector.broadcast %cst_48 : f32 to vector<16x1xf32>
    %173 = arith.divf %171, %172 : vector<16x1xf32>
    %174 = vector.broadcast %173 : vector<16x1xf32> to vector<16x32xf32>
    %175 = arith.subf %169, %174 : vector<16x32xf32>
    %176 = arith.mulf %175, %175 : vector<16x32xf32>
    %cst_49 = arith.constant dense<0.000000e+00> : vector<16xf32>
    %177 = vector.multi_reduction <add>, %176, %cst_49 [1] : vector<16x32xf32> to vector<16xf32>
    %178 = vector.shape_cast %177 : vector<16xf32> to vector<16x1xf32>
    %cst_50 = arith.constant 3.200000e+01 : f32
    %179 = vector.broadcast %cst_50 : f32 to vector<16x1xf32>
    %180 = arith.divf %178, %179 : vector<16x1xf32>
    %181 = vector.broadcast %173 : vector<16x1xf32> to vector<16x32xf32>
    %182 = arith.subf %169, %181 : vector<16x32xf32>
    %cst_51 = arith.constant 9.99999974E-6 : f32
    %183 = vector.broadcast %cst_51 : f32 to vector<16x1xf32>
    %184 = arith.addf %180, %183 : vector<16x1xf32>
    %185 = math.rsqrt %184 : vector<16x1xf32>
    %186 = vector.broadcast %185 : vector<16x1xf32> to vector<16x32xf32>
    %187 = arith.mulf %182, %186 : vector<16x32xf32>
    %188 = vector.broadcast %8 : vector<1x32xf32> to vector<16x32xf32>
    %189 = arith.mulf %187, %188 : vector<16x32xf32>
    %190 = vector.broadcast %9 : vector<1x32xf32> to vector<16x32xf32>
    %191 = arith.addf %189, %190 : vector<16x32xf32>
    %c0_52 = arith.constant 0 : index
    %c0_53 = arith.constant 0 : index
    %192 = vector.load %arg6[%c0_52, %c0_53] : memref<16x32xf32, #tpu.memory_space<vmem>>, vector<16x32xf32>
    tpu.vector_store %arg6[%c0_52, %c0_53], %191 {strides = array<i32>} : memref<16x32xf32, #tpu.memory_space<vmem>>, vector<16x32xf32>,
    return
  }
}

</mosaic_0001>

<bundles_post_ra>
// kernel: tpu_custom_call.1
= control target key start
LH: loop header
LB: loop body
LE: loop exit
PB: predicated region body
PF: predicated region fallthrough
CT: control target
= control target key end

     0   :  { %vm35_vm0 = vcmask 261120   ;;  %s3708_s0 = inlined_call_operand.vmem [shape: f32[16,32], index: 0, kind: input, shape index: {}]   ;;  %s3709_s1 = inlined_call_operand.vmem [shape: f32[32,128], index: 1, kind: input, shape index: {}]   ;;  %s3710_s2 = inlined_call_operand.vmem [shape: f32[64,32], index: 2, kind: input, shape index: {}]   ;;  %s3711_s3 = inlined_call_operand.vmem [shape: f32[32,64], index: 3, kind: input, shape index: {}]   ;;  %s3712_s4 = inlined_call_operand.vmem [shape: f32[64,32], index: 4, kind: input, shape index: {}]   ;;  %s3713_s5 = inlined_call_operand.vmem [shape: f32[8,128], index: 5, kind: input, shape index: {}]   ;;  %s3714_s6 = inlined_call_operand.hbm [shape: f32[16,32], index: 6, kind: output, shape index: {}]  }
   0x1   :  { %v27_v0 = vld [vmem:[%s3709_s1] sm:$0xff]  ;;  %v28_v1 = vld [vmem:[%s3709_s1 + $0x8] sm:$0xff]  ;;  %v29_v2 = vld [vmem:[%s3709_s1 + $0x10] sm:$0xff] }
   0x2   :  { %v2898_v3 = vpack.c.bf16 %v28_v1, %v27_v0  ;;  %v30_v4 = vld [vmem:[%s3709_s1 + $0x18] sm:$0xff]  ;;  %v24_v5 = vld [vmem:[%s3708_s0] sm:$0xff] }
   0x3   :  { %v2902_v6 = vpack.c.bf16 %v30_v4, %v29_v2  ;;  %2682 = vmatprep.mubr.msk.f32.mxu0 %vm35_vm0, %v24_v5 }
   0x4   :  { %11 = vsyncpa [#allocation3], 0  ;;  %2899 = vmatprep.subr.bf16.mxu0 %v2898_v3  ;;  %v25_v7 = vld [vmem:[%s3708_s0 + $0x8] sm:$0xff]  ;;  %v31_v8 = vlaneseq  ;;  %v26_v15 = vld [vmem:[%s3713_s5] sm:$0xff]  ;;  %v3060_v23 = vmov 1.0   ;;  %s3061_s10 = smov 112  }
   0x5   :  { %2901 = vmatpush3.bf16.msra.mxu0 %v2898_v3  ;;  %s3062_s11 = smov 120   ;;  %s3063_s12 = smov 104   ;;  %v3065_v25 = vmov 0.0   ;;  %vm3066_vm4 = vmmov 0   ;;  %vm216_vm5 = vcmask 64512  }
   0x6   :  { %2903 = vmatprep.subr.bf16.mxu0 %v2902_v6  ;;  %v3130_v9 = vand.u32 127, %v31_v8  ;;  %v3132_v10 = vshrl.u32 %v31_v8, 7  ;;  %s3064_s13 = smov 32   ;;  %s3067_s14 = smov 96   ;;  %v3068_v48 = vmov 1.0|1.0  }
   0x7   :  { %s3069_s15 = smov 64   ;;  %s3070_s16 = smov 8  }
   0x8   :  { %v3135_v11 = vshra.s32 %v3130_v9, 3  ;;  %v122_v12 = vand.u32 7, %v3130_v9  ;;  %v33_v14 = vsub.s32 0, %v3132_v10  ;;  %v3197_v34 = vadd.s32 8, %v3132_v10  ;;  %s3071_s17 = smov 16   ;;  %s3072_s18 = smov 24  }
   0x9   :  { %2905 = vmatpush3.bf16.msra.mxu0 %v2902_v6  ;;  %v146_v35 = vand.u32 7, %v3132_v10  ;;  %v3201_v36 = vadd.s32 16, %v3132_v10  ;;  %v3204_v37 = vadd.s32 24, %v3132_v10  ;;  %v3207_v38 = vadd.s32 32, %v3132_v10 }
   0xa   :  { %v123_v13 = vsub.s32 %v122_v12, %v3135_v11  ;;  %v34_v17 = vrot.slane %v26_v15, %v33_v14  ;;  %2732 = vmatprep.subr.mxu0 %v3065_v25  ;;  %v3210_v39 = vadd.s32 40, %v3132_v10  ;;  %v3213_v40 = vadd.s32 48, %v3132_v10 }
   0xb   :  { %v147_v41 = vand.u32 7, %v3197_v34  ;;  %vm170_vm6 = vcmp.eq.s32.totalorder %v146_v35, %v3130_v9  ;;  %v148_v42 = vand.u32 7, %v3201_v36  ;;  %v3223_v43 = vadd.s32 56, %v3132_v10 }
   0xc   :  { %2683 = vmatmul.mubr.msk.f32.vlgmr.msra.gmra.mrb[0].mxu0 %vm35_vm0, %v25_v7  ;;  %vm124_vm1 = vcmp.gt.s32.totalorder %v123_v13, 4294967293  ;;  %v149_v44 = vand.u32 7, %v3204_v37  ;;  %v150_v45 = vand.u32 7, %v3207_v38  ;;  %v151_v46 = vand.u32 7, %v3210_v39 }
   0xd   :  { %v125_v16 = vsel %vm124_vm1, %v123_v13, 4294967293  ;;  %2734 = vmatprep.mubr.msk.f32.mxu0 %vm3066_vm4, %v3065_v25  ;;  %vm171_vm7 = vcmp.eq.s32.totalorder %v147_v41, %v3130_v9  ;;  %vm172_vm8 = vcmp.eq.s32.totalorder %v148_v42, %v3130_v9  ;;  %v152_v50 = vand.u32 7, %v3213_v40 }
   0xe   :  { %vm126_vm2 = vcmp.lt.s32.totalorder %v125_v16, 3  ;;  %vm3234_vm9 = vmpackc.low %vm171_vm7, %vm170_vm6  ;;  %vm173_vm10 = vcmp.eq.s32.totalorder %v149_v44, %v3130_v9  ;;  %vm174_vm12 = vcmp.eq.s32.totalorder %v150_v45, %v3130_v9  ;;  %vm175_vm13 = vcmp.eq.s32.totalorder %v151_v46, %v3130_v9 }
   0xf   :  { %v127_v18 = vsel %vm126_vm2, %v125_v16, 3  ;;  %vm3245_vm11 = vmpackc.low %vm173_vm10, %vm172_vm8  ;;  %v153_v51 = vand.u32 7, %v3223_v43  ;;  %vm176_vm15 = vcmp.eq.s32.totalorder %v152_v50, %v3130_v9  ;;  %vm155_vm6 = vcmp.eq.s32.totalorder %v147_v41, %v3135_v11 }
  0x10   :  { %v128_v19 = vadd.s32 3, %v127_v18  ;;  %vm3263_vm14 = vmpackc.low %vm175_vm13, %vm174_vm12  ;;  %v3347_v5 = vsel %vm155_vm6, 1.0, %v3065_v25  ;;  %vm346_vm7 = vcmask 523264   ;;  %vm156_vm8 = vcmp.eq.s32.totalorder %v148_v42, %v3135_v11 }
  0x11   :  { %vm177_vm1 = vcmp.eq.s32.totalorder %v153_v51, %v3130_v9  ;;  %vm157_vm10 = vcmp.eq.s32.totalorder %v149_v44, %v3135_v11  ;;  %v3362_v14 = vsel %vm156_vm8, 1.0, %v3065_v25  ;;  %vm158_vm12 = vcmp.eq.s32.totalorder %v150_v45, %v3135_v11 }
  0x12   :  { %vm129_vm3 = vcmp.eq.s32.totalorder %v128_v19, %v3132_v10  ;;  %vm3279_vm2 = vmpackc.low %vm177_vm1, %vm176_vm15  ;;  %v3365_v15 = vsel %vm157_vm10, 1.0, %v3065_v25  ;;  %vm159_vm13 = vcmp.eq.s32.totalorder %v151_v46, %v3135_v11  ;;  %vm160_vm15 = vcmp.eq.s32.totalorder %v152_v50, %v3135_v11 }
  0x13   :  { %2685 = vmatprep.subr.msk.mxu1 %vm129_vm3, %v3060_v23  ;;  %vm161_vm1 = vcmp.eq.s32.totalorder %v153_v51, %v3135_v11  ;;  %v3392_v36 = vsel %vm160_vm15, 1.0, %v3065_v25 }
  0x14   :  { %2686 = vmatpush3.msk.msra.mxu1 %vm129_vm3, %v3060_v23  ;;  %vm154_vm3 = vcmp.eq.s32.totalorder %v146_v35, %v3135_v11  ;;  %v3395_v37 = vsel %vm161_vm1, 1.0, %v3065_v25 }
  0x15   :  { %2907 = vmatprep.subr.msk.bf16.mxu1 %vm3234_vm9, %v3068_v48  ;;  %v3344_v4 = vsel %vm154_vm3, 1.0, %v3065_v25 }
  0xdf   :  { %v2684_v20 = vpop.f32.mrb[0].mxu0 }
  0xe0   :  { %v108_v21 = vpop.f32.mrb[1].mxu0  ;;  %v3152_v24 = vadd.f32 %v2684_v20, %v34_v17  ;;  %v3376_v20 = vsel %vm158_vm12, 1.0, %v3065_v25 }
  0xe1   :  { %v3146_v22 = vadd.f32 %v108_v21, %v34_v17  ;;  %v3379_v21 = vsel %vm159_vm13, 1.0, %v3065_v25 }
  0xe3   :  { %192 = vrot.lane.b32.xlu1 %v3146_v22, %s3061_s10  ;;  %188 = vrot.lane.b32.xlu0 %v3146_v22, %s3062_s11 }
  0xe7   :  { %194 = vrot.lane.b32.xlu1 %v3152_v24, %s3061_s10  ;;  %190 = vrot.lane.b32.xlu0 %v3152_v24, %s3062_s11 }
  0xeb   :  { %198 = vrot.lane.b32.xlu1 %v3152_v24, %s3063_s12  ;;  %196 = vrot.lane.b32.xlu0 %v3146_v22, %s3063_s12 }
  0xef   :  { %202 = vrot.lane.b32.xlu1 %v3152_v24, %s3064_s13  ;;  %200 = vrot.lane.b32.xlu0 %v3146_v22, %s3064_s13 }
 0x155   :  { %v3163_v26 = vpop.permute.xlu1 %192  ;;  %v3165_v27 = vpop.permute.xlu0 %188 }
 0x156   :  { %204 = vrot.lane.b32.xlu0 %v3165_v27, %s3064_s13 }
 0x159   :  { %v3171_v28 = vpop.permute.xlu1 %194  ;;  %v3173_v29 = vpop.permute.xlu0 %190 }
 0x15a   :  { %208 = vrot.lane.b32.xlu0 %v3163_v26, %s3064_s13  ;;  %206 = vrot.lane.b32.xlu1 %v3173_v29, %s3064_s13 }
 0x15d   :  { %v3179_v30 = vpop.permute.xlu1 %198  ;;  %v3181_v31 = vpop.permute.xlu0 %196 }
 0x15e   :  { %210 = vrot.lane.b32.xlu1 %v3171_v28, %s3064_s13  ;;  %212 = vrot.lane.b32.xlu0 %v3181_v31, %s3064_s13 }
 0x161   :  { %v203_v32 = vpop.permute.xlu1 %202  ;;  %v201_v33 = vpop.permute.xlu0 %200 }
 0x162   :  { %214 = vrot.lane.b32.xlu1 %v3179_v30, %s3064_s13  ;;  %552 = vrot.lane.b32.xlu0 %v3152_v24, %s3067_s14 }
 0x163   :  { %2687 = vmatprep.mubr.msk.f32.mxu1 %vm216_vm5, %v201_v33 }
 0x164   :  { %2688 = vmatmul.mubr.msk.f32.vlgmr.msra.gmra.mrb[0].mxu1 %vm216_vm5, %v203_v32 }
 0x165   :  { %2909 = vmatpush3.bf16.msk.msra.mxu1 %vm3234_vm9, %v3068_v48 }
 0x166   :  { %476 = vrot.lane.b32.xlu1 %v3146_v22, %s3067_s14  ;;  %628 = vrot.lane.b32.xlu0 %v3165_v27, %s3067_s14 }
 0x167   :  { %2911 = vmatprep.subr.msk.bf16.mxu1 %vm3245_vm11, %v3068_v48 }
 0x169   :  { %2913 = vmatpush3.bf16.msk.msra.mxu1 %vm3245_vm11, %v3068_v48 }
 0x16a   :  { %704 = vrot.lane.b32.xlu1 %v3173_v29, %s3067_s14  ;;  %780 = vrot.lane.b32.xlu0 %v3163_v26, %s3067_s14 }
 0x16b   :  { %2915 = vmatprep.subr.msk.bf16.mxu1 %vm3263_vm14, %v3068_v48 }
 0x16d   :  { %2917 = vmatpush3.bf16.msk.msra.mxu1 %vm3263_vm14, %v3068_v48 }
 0x16e   :  { %932 = vrot.lane.b32.xlu1 %v3181_v31, %s3067_s14  ;;  %856 = vrot.lane.b32.xlu0 %v3171_v28, %s3067_s14 }
 0x16f   :  { %2919 = vmatprep.subr.msk.bf16.mxu1 %vm3279_vm2, %v3068_v48 }
 0x171   :  { %2921 = vmatpush3.bf16.msk.msra.mxu1 %vm3279_vm2, %v3068_v48 }
 0x172   :  { %1008 = vrot.lane.b32.xlu1 %v3179_v30, %s3067_s14  ;;  %2727 = vmatprep.subr.mxu1 %v3065_v25 }
 0x1c8   :  { %v205_v54 = vpop.permute.xlu0 %204 }
 0x1c9   :  { %2690 = vmatprep.mubr.msk.f32.mxu1 %vm216_vm5, %v205_v54 }
 0x1cc   :  { %v207_v55 = vpop.permute.xlu1 %206  ;;  %v209_v56 = vpop.permute.xlu0 %208 }
 0x1cd   :  { %2691 = vmatmul.mubr.msk.f32.gmra.mrb[2].mxu1 %vm216_vm5, %v207_v55 }
 0x1ce   :  { %2693 = vmatprep.mubr.msk.f32.mxu1 %vm216_vm5, %v209_v56 }
 0x1d0   :  { %v211_v57 = vpop.permute.xlu1 %210  ;;  %v213_v58 = vpop.permute.xlu0 %212 }
 0x1d1   :  { %2694 = vmatmul.mubr.msk.f32.gmra.mrb[4].mxu1 %vm216_vm5, %v211_v57 }
 0x1d2   :  { %2696 = vmatprep.mubr.msk.f32.mxu1 %vm216_vm5, %v213_v58 }
 0x1d4   :  { %v215_v59 = vpop.permute.xlu1 %214  ;;  %v553_v60 = vpop.permute.xlu0 %552 }
 0x1d5   :  { %2697 = vmatmul.mubr.msk.f32.gmra.mrb[6].mxu1 %vm216_vm5, %v215_v59  ;;  %2733 = vmatpush3.xpose.msk.msra.mxu0 %vm216_vm5, %v553_v60 }
 0x1d6   :  { %2737 = vmatprep.subr.mxu0 %v3065_v25 }
 0x1d8   :  { %v477_v61 = vpop.permute.xlu1 %476  ;;  %2735 = vmatmul.mubr.msk.f32.vlgmr.msra.gmra.mrb[2].mxu0 %vm216_vm5, %v3152_v24  ;;  %v629_v62 = vpop.permute.xlu0 %628 }
 0x1d9   :  { %2738 = vmatpush3.xpose.msk.msra.mxu0 %vm216_vm5, %v629_v62  ;;  %2739 = vmatprep.mubr.msk.f32.mxu0 %vm3066_vm4, %v3065_v25 }
 0x1da   :  { %2742 = vmatprep.subr.mxu0 %v3065_v25 }
 0x1dc   :  { %v705_v63 = vpop.permute.xlu1 %704  ;;  %2740 = vmatmul.mubr.msk.f32.vlgmr.msra.gmra.mrb[4].mxu0 %vm216_vm5, %v3165_v27  ;;  %v781_v0 = vpop.permute.xlu0 %780 }
 0x1dd   :  { %2743 = vmatpush3.xpose.msk.msra.mxu0 %vm216_vm5, %v705_v63  ;;  %2744 = vmatprep.mubr.msk.f32.mxu0 %vm3066_vm4, %v3065_v25 }
 0x1de   :  { %2747 = vmatprep.subr.mxu0 %v3065_v25 }
 0x1e0   :  { %2745 = vmatmul.mubr.msk.f32.vlgmr.msra.gmra.mrb[6].mxu0 %vm216_vm5, %v3173_v29  ;;  %v3318_v1 = vpop.permute.xlu1 %932  ;;  %v857_v2 = vpop.permute.xlu0 %856 }
 0x1e1   :  { %2748 = vmatpush3.xpose.msk.msra.mxu0 %vm216_vm5, %v781_v0  ;;  %2749 = vmatprep.mubr.msk.f32.mxu0 %vm3066_vm4, %v3065_v25 }
 0x1e2   :  { %2752 = vmatprep.subr.mxu0 %v3065_v25 }
 0x1e4   :  { %2750 = vmatmul.mubr.msk.f32.vlgmr.msra.gmra.mrb[8].mxu0 %vm216_vm5, %v3163_v26  ;;  %v1009_v3 = vpop.permute.xlu1 %1008 }
 0x1e5   :  { %2753 = vmatpush3.xpose.msk.msra.mxu0 %vm216_vm5, %v857_v2  ;;  %2754 = vmatprep.mubr.msk.f32.mxu0 %vm3066_vm4, %v3065_v25 }
 0x1e6   :  { %2762 = vmatprep.subr.mxu0 %v3065_v25 }
 0x1e8   :  { %2755 = vmatmul.mubr.msk.f32.vlgmr.msra.gmra.mrb[10].mxu0 %vm216_vm5, %v3171_v28 }
 0x1e9   :  { %2763 = vmatpush3.xpose.msk.msra.mxu0 %vm216_vm5, %v1009_v3  ;;  %2764 = vmatprep.mubr.msk.f32.mxu0 %vm3066_vm4, %v3065_v25 }
 0x1ea   :  { %2772 = vmatprep.subr.mxu0 %v3065_v25 }
 0x1ec   :  { %2765 = vmatmul.mubr.msk.f32.vlgmr.msra.gmra.mrb[12].mxu0 %vm216_vm5, %v3179_v30 }
 0x1ed   :  { %2774 = vmatprep.mubr.msk.f32.mxu0 %vm3066_vm4, %v3065_v25 }
 0x237   :  { %v2689_v6 = vpop.f32.mrb[0].mxu1 }
 0x238   :  { %v299_v7 = vpop.f32.mrb[1].mxu1  ;;  %v339_v13 = vmul.f32 %v2689_v6, %v3347_v5 }
 0x239   :  { %v338_v8 = vmul.f32 %v299_v7, %v3344_v4 }
 0x23b   :  { %2715 = vmatprep.mubr.msk.f32.mxu1 %vm346_vm7, %v338_v8 }
 0x23c   :  { %2716 = vmatmul.mubr.msk.f32.vlgmr.msra.gmra.mrb[8].mxu1 %vm346_vm7, %v339_v13 }
 0x23d   :  { %2728 = vmatpush3.xpose.msk.msra.mxu1 %vm216_vm5, %v477_v61 }
 0x23e   :  { %2757 = vmatprep.subr.mxu1 %v3065_v25 }
 0x2a0   :  { %v2692_v16 = vpop.f32.mrb[2].mxu1 }
 0x2a1   :  { %v309_v17 = vpop.f32.mrb[3].mxu1  ;;  %v341_v19 = vmul.f32 %v2692_v16, %v3365_v15 }
 0x2a2   :  { %v340_v18 = vmul.f32 %v309_v17, %v3362_v14 }
 0x2a4   :  { %v2695_v32 = vpop.f32.mrb[4].mxu1  ;;  %2718 = vmatprep.mubr.msk.f32.mxu1 %vm346_vm7, %v340_v18 }
 0x2a5   :  { %v319_v33 = vpop.f32.mrb[5].mxu1  ;;  %2719 = vmatmul.mubr.msk.f32.gmra.mrb[10].mxu1 %vm346_vm7, %v341_v19  ;;  %v343_v35 = vmul.f32 %v2695_v32, %v3379_v21 }
 0x2a6   :  { %v342_v34 = vmul.f32 %v319_v33, %v3376_v20 }
 0x2a8   :  { %v2698_v38 = vpop.f32.mrb[6].mxu1  ;;  %2721 = vmatprep.mubr.msk.f32.mxu1 %vm346_vm7, %v342_v34 }
 0x2a9   :  { %v329_v39 = vpop.f32.mrb[7].mxu1  ;;  %2722 = vmatmul.mubr.msk.f32.gmra.mrb[12].mxu1 %vm346_vm7, %v343_v35  ;;  %v345_v41 = vmul.f32 %v2698_v38, %v3395_v37 }
 0x2aa   :  { %v344_v40 = vmul.f32 %v329_v39, %v3392_v36 }
 0x2ab   :  { %v624_v42 = vpop.f32.mrb[2].mxu0 }
 0x2ac   :  { %2724 = vmatprep.mubr.msk.f32.mxu1 %vm346_vm7, %v344_v40  ;;  %v2736_v43 = vpop.f32.mrb[3].mxu0 }
 0x2ad   :  { %2725 = vmatmul.mubr.msk.f32.gmra.mrb[14].mxu1 %vm346_vm7, %v345_v41 }
 0x2ae   :  { %2729 = vmatprep.mubr.msk.f32.mxu1 %vm3066_vm4, %v3065_v25 }
 0x2af   :  { %v700_v44 = vpop.f32.mrb[4].mxu0 }
 0x2b0   :  { %v2741_v45 = vpop.f32.mrb[5].mxu0 }
 0x2b1   :  { %2730 = vmatmul.mubr.msk.f32.vlgmr.msra.gmra.mrb[16].mxu1 %vm216_vm5, %v3146_v22 }
 0x2b2   :  { %2758 = vmatpush3.xpose.msk.msra.mxu1 %vm216_vm5, %v3318_v1  ;;  %2759 = vmatprep.mubr.msk.f32.mxu1 %vm3066_vm4, %v3065_v25 }
 0x2b3   :  { %v776_v46 = vpop.f32.mrb[6].mxu0  ;;  %2767 = vmatprep.subr.mxu1 %v3065_v25 }
 0x2b4   :  { %v2746_v50 = vpop.f32.mrb[7].mxu0 }
 0x2b5   :  { %2760 = vmatmul.mubr.msk.f32.vlgmr.msra.gmra.mrb[18].mxu1 %vm216_vm5, %v3181_v31 }
 0x2b6   :  { %2769 = vmatprep.mubr.msk.f32.mxu1 %vm3066_vm4, %v3065_v25 }
 0x2b7   :  { %v852_v51 = vpop.f32.mrb[8].mxu0 }
 0x2b8   :  { %v2751_v54 = vpop.f32.mrb[9].mxu0 }
 0x2bb   :  { %v928_v55 = vpop.f32.mrb[10].mxu0 }
 0x2bc   :  { %v2756_v56 = vpop.f32.mrb[11].mxu0 }
 0x2bf   :  { %v1080_v57 = vpop.f32.mrb[12].mxu0 }
 0x2c0   :  { %v2766_v58 = vpop.f32.mrb[13].mxu0 }
 0x30f   :  { %v2717_v59 = vpop.f32.mrb[8].mxu1 }
 0x310   :  { %v625_v60 = vadd.f32 %v2717_v59, %v624_v42  ;;  %v437_v61 = vpop.f32.mrb[9].mxu1 }
 0x312   :  { %v1085_v8 = vmul.f32 0.35355338, %v625_v60 }
 0x314   :  { %v1095_v33 = vsel %vm216_vm5, %v1085_v8, -inf }
 0x378   :  { %v2720_v62 = vpop.f32.mrb[10].mxu1 }
 0x379   :  { %v777_v63 = vadd.f32 %v2720_v62, %v776_v46  ;;  %v447_v0 = vpop.f32.mrb[11].mxu1 }
 0x37a   :  { %v701_v1 = vadd.f32 %v700_v44, %v447_v0 }
 0x37c   :  { %v3416_v2 = vmul.f32 0.35355338, %v701_v1  ;;  %v2723_v3 = vpop.f32.mrb[12].mxu1 }
 0x37d   :  { %v929_v6 = vadd.f32 %v2723_v3, %v928_v55  ;;  %v457_v7 = vpop.f32.mrb[13].mxu1 }
 0x37e   :  { %v853_v13 = vadd.f32 %v852_v51, %v457_v7  ;;  %v1098_v16 = vsel %vm216_vm5, %v3416_v2, -inf  ;;  %v1087_v51 = vmul.f32 0.35355338, %v777_v63 }
 0x37f   :  { %1099 = vmax.xlane.f32.xlu1 %v1098_v16  ;;  %v1089_v32 = vmul.f32 0.35355338, %v929_v6 }
 0x380   :  { %v2726_v17 = vpop.f32.mrb[14].mxu1  ;;  %v1088_v42 = vmul.f32 0.35355338, %v853_v13  ;;  %v1101_v56 = vsel %vm216_vm5, %v1087_v51, -inf }
 0x381   :  { %v1081_v18 = vadd.f32 %v2726_v17, %v1080_v57  ;;  %v467_v19 = vpop.f32.mrb[15].mxu1  ;;  %v1107_v39 = vsel %vm216_vm5, %v1089_v32, -inf }
 0x382   :  { %v1104_v50 = vsel %vm216_vm5, %v1088_v42, -inf }
 0x383   :  { %1096 = vmax.xlane.f32.xlu1 %v1095_v33  ;;  %v1091_v55 = vmul.f32 0.35355338, %v1081_v18 }
 0x384   :  { %v548_v34 = vpop.f32.mrb[16].mxu1 }
 0x385   :  { %v549_v35 = vadd.f32 %v548_v34, %v437_v61  ;;  %v2731_v38 = vpop.f32.mrb[17].mxu1  ;;  %v1113_v57 = vsel %vm216_vm5, %v1091_v55, -inf }
 0x387   :  { %v1084_v40 = vmul.f32 0.35355338, %v549_v35  ;;  %1108 = vmax.xlane.f32.xlu1 %v1107_v39 }
 0x388   :  { %v1004_v41 = vpop.f32.mrb[18].mxu1 }
 0x389   :  { %v1005_v43 = vadd.f32 %v1004_v41, %v467_v19  ;;  %v2761_v44 = vpop.f32.mrb[19].mxu1  ;;  %v1092_v45 = vsel %vm216_vm5, %v1084_v40, -inf }
 0x38a   :  { %1093 = vmax.xlane.f32.xlu0 %v1092_v45 }
 0x38b   :  { %v1090_v46 = vmul.f32 0.35355338, %v1005_v43 }
 0x38d   :  { %v1110_v54 = vsel %vm216_vm5, %v1090_v46, -inf }
 0x38e   :  { %1105 = vmax.xlane.f32.xlu0 %v1104_v50 }
 0x392   :  { %1111 = vmax.xlane.f32.xlu0 %v1110_v54 }
 0x396   :  { %1102 = vmax.xlane.f32.xlu0 %v1101_v56 }
 0x39a   :  { %1114 = vmax.xlane.f32.xlu0 %v1113_v57 }
 0x3b0   :  { %1180 = vrot.lane.b32.xlu0 %v3146_v22, %s3069_s15 }
 0x40c   :  { %v1100_v58 = vpop.xlane.xlu1 %1099 }
 0x410   :  { %v1097_v59 = vpop.xlane.xlu1 %1096 }
 0x411   :  { %v1117_v60 = vsub.f32 %v1085_v8, %v1097_v59  ;;  %v1118_v8 = vsub.f32 %v3416_v2, %v1100_v58 }
 0x413   :  { %v1126_v61 = vmul.f32 1.442695, %v1117_v60  ;;  %v1128_v34 = vmul.f32 1.442695, %v1118_v8 }
 0x414   :  { %v1109_v62 = vpop.xlane.xlu1 %1108 }
 0x415   :  { %2993 = vpow2.f32 %v1126_v61  ;;  %v1121_v63 = vsub.f32 %v1089_v32, %v1109_v62 }
 0x417   :  { %v1134_v0 = vmul.f32 1.442695, %v1121_v63  ;;  %v1094_v1 = vpop.xlane.xlu0 %1093 }
 0x418   :  { %v1116_v33 = vsub.f32 %v1084_v40, %v1094_v1 }
 0x419   :  { %2995 = vpow2.f32 %v1134_v0 }
 0x41b   :  { %v1106_v3 = vpop.xlane.xlu0 %1105 }
 0x41c   :  { %v1120_v6 = vsub.f32 %v1088_v42, %v1106_v3  ;;  %v1124_v42 = vmul.f32 1.442695, %v1116_v33 }
 0x41e   :  { %v1132_v7 = vmul.f32 1.442695, %v1120_v6 }
 0x41f   :  { %v3429_v13 = vpop.eup %2993  ;;  %v1112_v16 = vpop.xlane.xlu0 %1111 }
 0x420   :  { %2997 = vpow2.f32 %v1132_v7  ;;  %v1143_v22 = vsel %vm216_vm5, %v3429_v13, 0.0  ;;  %v1122_v35 = vsub.f32 %v1090_v46, %v1112_v16 }
 0x421   :  { %1144 = vadd.xlane.f32.xlu1 %v1143_v22 }
 0x422   :  { %v1136_v2 = vmul.f32 1.442695, %v1122_v35 }
 0x423   :  { %v3434_v17 = vpop.eup %2995  ;;  %v1103_v18 = vpop.xlane.xlu0 %1102 }
 0x424   :  { %v1119_v19 = vsub.f32 %v1087_v51, %v1103_v18  ;;  %v1155_v32 = vsel %vm216_vm5, %v3434_v17, 0.0 }
 0x425   :  { %1156 = vadd.xlane.f32.xlu1 %v1155_v32 }
 0x426   :  { %v1130_v38 = vmul.f32 1.442695, %v1119_v19 }
 0x427   :  { %v1115_v39 = vpop.xlane.xlu0 %1114 }
 0x428   :  { %2999 = vpow2.f32 %v1130_v38  ;;  %v1123_v41 = vsub.f32 %v1091_v55, %v1115_v39 }
 0x429   :  { %3001 = vpow2.f32 %v1128_v34 }
 0x42a   :  { %v3438_v43 = vpop.eup %2997  ;;  %v1138_v44 = vmul.f32 1.442695, %v1123_v41 }
 0x42b   :  { %v1181_v45 = vpop.permute.xlu0 %1180  ;;  %v1152_v50 = vsel %vm216_vm5, %v3438_v43, 0.0 }
 0x42c   :  { %3003 = vpow2.f32 %v1138_v44  ;;  %1153 = vadd.xlane.f32.xlu1 %v1152_v50  ;;  %2768 = vmatpush3.msra.mxu1 %v1181_v45 }
 0x42d   :  { %3005 = vpow2.f32 %v1124_v42  ;;  %2777 = vmatprep.subr.mxu1 %v3065_v25 }
 0x42e   :  { %3007 = vpow2.f32 %v1136_v2 }
 0x432   :  { %v3000_v40 = vpop.eup %2999 }
 0x433   :  { %v1149_v46 = vsel %vm216_vm5, %v3000_v40, 0.0  ;;  %v3444_v51 = vpop.eup %3001 }
 0x434   :  { %1150 = vadd.xlane.f32.xlu0 %v1149_v46  ;;  %v1146_v56 = vsel %vm216_vm5, %v3444_v51, 0.0 }
 0x436   :  { %v3446_v54 = vpop.eup %3003 }
 0x437   :  { %v3006_v55 = vpop.eup %3005  ;;  %v1161_v57 = vsel %vm216_vm5, %v3446_v54, 0.0 }
 0x438   :  { %v3452_v58 = vpop.eup %3007  ;;  %1147 = vadd.xlane.f32.xlu0 %v1146_v56  ;;  %1162 = vadd.xlane.f32.xlu1 %v1161_v57  ;;  %v1140_v60 = vsel %vm216_vm5, %v3006_v55, 0.0 }
 0x439   :  { %v1158_v59 = vsel %vm216_vm5, %v3452_v58, 0.0 }
 0x43c   :  { %1159 = vadd.xlane.f32.xlu0 %v1158_v59  ;;  %1141 = vadd.xlane.f32.xlu1 %v1140_v60 }
 0x44d   :  { %1332 = vrot.lane.b32.xlu1 %v3165_v27, %s3069_s15 }
 0x451   :  { %1636 = vrot.lane.b32.xlu1 %v3181_v31, %s3069_s15 }
 0x452   :  { %1484 = vrot.lane.b32.xlu0 %v3163_v26, %s3069_s15 }
 0x455   :  { %1408 = vrot.lane.b32.xlu1 %v3173_v29, %s3069_s15 }
 0x456   :  { %1256 = vrot.lane.b32.xlu0 %v3152_v24, %s3069_s15  ;;  %v131_v24 = vsub.s32 %v3132_v10, %v3135_v11 }
 0x458   :  { %vm132_vm3 = vcmp.gt.s32.totalorder %v131_v24, 4294967293 }
 0x459   :  { %1712 = vrot.lane.b32.xlu1 %v3179_v30, %s3069_s15  ;;  %v133_v16 = vsel %vm132_vm3, %v131_v24, 4294967293 }
 0x45a   :  { %1560 = vrot.lane.b32.xlu0 %v3171_v28, %s3069_s15  ;;  %vm134_vm6 = vcmp.lt.s32.totalorder %v133_v16, 3 }
 0x45b   :  { %v135_v33 = vsel %vm134_vm6, %v133_v16, 3 }
 0x45c   :  { %v136_v42 = vadd.s32 3, %v135_v33 }
 0x45e   :  { %vm137_vm8 = vcmp.eq.s32.totalorder %v136_v42, %v122_v12 }
 0x4ae   :  { %v1145_v61 = vpop.xlane.xlu1 %1144 }
 0x4af   :  { %3009 = vrcp.f32 %v1145_v61 }
 0x4b2   :  { %v1157_v27 = vpop.xlane.xlu1 %1156 }
 0x4b9   :  { %v1154_v62 = vpop.xlane.xlu1 %1153  ;;  %v3010_v3 = vpop.eup %3009 }
 0x4ba   :  { %v1167_v28 = vmul.f32 %v3010_v3, %v3429_v13 }
 0x4c1   :  { %v1151_v63 = vpop.xlane.xlu0 %1150 }
 0x4c2   :  { %3011 = vrcp.f32 %v1151_v63 }
 0x4c5   :  { %v1163_v31 = vpop.xlane.xlu1 %1162  ;;  %v1148_v0 = vpop.xlane.xlu0 %1147 }
 0x4c9   :  { %v1142_v26 = vpop.xlane.xlu1 %1141  ;;  %v1160_v1 = vpop.xlane.xlu0 %1159 }
 0x4ca   :  { %3013 = vrcp.f32 %v1142_v26 }
 0x4cb   :  { %3015 = vrcp.f32 %v1148_v0 }
 0x4cc   :  { %3017 = vrcp.f32 %v1157_v27  ;;  %v3012_v22 = vpop.eup %3011 }
 0x4cd   :  { %v1333_v29 = vpop.permute.xlu1 %1332  ;;  %v1485_v30 = vpop.permute.xlu0 %1484  ;;  %3019 = vrcp.f32 %v1154_v62  ;;  %v1171_v8 = vmul.f32 %v3012_v22, %v3000_v40  ;;  %v2105_v22 = vld [vmem:[%s3710_s2 + $0x18] sm:$0xff] }
 0x4ce   :  { %3021 = vrcp.f32 %v1163_v31 }
 0x4cf   :  { %3023 = vrcp.f32 %v1160_v1 }
 0x4d1   :  { %v1637_v6 = vpop.permute.xlu1 %1636  ;;  %v1257_v7 = vpop.permute.xlu0 %1256 }
 0x4d2   :  { %2773 = vmatpush3.msra.mxu0 %v1257_v7  ;;  %v2104_v7 = vld [vmem:[%s3710_s2 + $0x10] sm:$0xff] }
 0x4d3   :  { %2775 = vmatmul.mubr.msk.f32.vlgmr.msra.gmra.mrb[14].mxu0 %vm216_vm5, %v1167_v28  ;;  %2782 = vmatprep.subr.mxu0 %v3065_v25 }
 0x4d4   :  { %v3014_v11 = vpop.eup %3013  ;;  %2784 = vmatprep.mubr.msk.f32.mxu0 %vm3066_vm4, %v3065_v25 }
 0x4d5   :  { %v1165_v18 = vmul.f32 %v3014_v11, %v3006_v55  ;;  %v1409_v19 = vpop.permute.xlu1 %1408  ;;  %v3016_v13 = vpop.eup %3015  ;;  %v2942_v11 = vpack.c.bf16 %v2105_v22, %v2104_v7  ;;  %v2239_v22 = vld [vmem:[%s3711_s3 + $0x18] sm:$0xff] }
 0x4d6   :  { %2783 = vmatpush3.msra.mxu0 %v1409_v19  ;;  %v3018_v32 = vpop.eup %3017  ;;  %v1561_v34 = vpop.permute.xlu0 %1560  ;;  %v1169_v35 = vmul.f32 %v3016_v13, %v3444_v51  ;;  %v2108_v13 = vld [vmem:[%s3710_s2 + $0x30] sm:$0xff] }
 0x4d7   :  { %2770 = vmatmul.mubr.msk.f32.vlgmr.msra.gmra.mrb[20].mxu1 %vm216_vm5, %v1165_v18  ;;  %2785 = vmatmul.mubr.msk.f32.vlgmr.msra.gmra.mrb[16].mxu0 %vm216_vm5, %v1171_v8  ;;  %v3020_v38 = vpop.eup %3019  ;;  %v1175_v39 = vmul.f32 %v3018_v32, %v3434_v17  ;;  %v2109_v32 = vld [vmem:[%s3710_s2 + $0x38] sm:$0xff] }
 0x4d8   :  { %2778 = vmatpush3.msra.mxu1 %v1333_v29  ;;  %2792 = vmatprep.subr.mxu0 %v3065_v25  ;;  %v3022_v2 = vpop.eup %3021  ;;  %v1173_v44 = vmul.f32 %v3020_v38, %v3438_v43  ;;  %v2950_v33 = vpack.c.bf16 %v2109_v32, %v2108_v13  ;;  %v2330_v32 = vld [vmem:[%s3712_s4 + $0x18] sm:$0xff] }
 0x4d9   :  { %2793 = vmatpush3.msra.mxu0 %v1561_v34  ;;  %2779 = vmatprep.mubr.msk.f32.mxu1 %vm3066_vm4, %v3065_v25  ;;  %v1713_v41 = vpop.permute.xlu1 %1712  ;;  %v3024_v17 = vpop.eup %3023  ;;  %v1179_v45 = vmul.f32 %v3022_v2, %v3446_v54 }
 0x4da   :  { %2787 = vmatprep.subr.mxu1 %v3065_v25  ;;  %2794 = vmatprep.mubr.msk.f32.mxu0 %vm3066_vm4, %v3065_v25  ;;  %v1177_v43 = vmul.f32 %v3024_v17, %v3452_v58 }
 0x4db   :  { %2802 = vmatprep.subr.mxu0 %v3065_v25  ;;  %2780 = vmatmul.mubr.msk.f32.vlgmr.msra.gmra.mrb[22].mxu1 %vm216_vm5, %v1169_v35 }
 0x4dc   :  { %2788 = vmatpush3.msra.mxu1 %v1485_v30  ;;  %2795 = vmatmul.mubr.msk.f32.vlgmr.msra.gmra.mrb[18].mxu0 %vm216_vm5, %v1175_v39 }
 0x4dd   :  { %2803 = vmatpush3.msra.mxu0 %v1713_v41  ;;  %2789 = vmatprep.mubr.msk.f32.mxu1 %vm3066_vm4, %v3065_v25 }
 0x4de   :  { %2797 = vmatprep.subr.mxu1 %v3065_v25  ;;  %2804 = vmatprep.mubr.msk.f32.mxu0 %vm3066_vm4, %v3065_v25 }
 0x4df   :  { %2790 = vmatmul.mubr.msk.f32.vlgmr.msra.gmra.mrb[24].mxu1 %vm216_vm5, %v1173_v44  ;;  %2923 = vmatprep.subr.msk.bf16.mxu0 %vm3234_vm9, %v3068_v48 }
 0x4e0   :  { %2798 = vmatpush3.msra.mxu1 %v1637_v6  ;;  %2805 = vmatmul.mubr.msk.f32.vlgmr.msra.gmra.mrb[20].mxu0 %vm216_vm5, %v1179_v45  ;;  %v2103_v6 = vld [vmem:[%s3710_s2 + $0x8] sm:$0xff] }
 0x4e1   :  { %2799 = vmatprep.mubr.msk.f32.mxu1 %vm3066_vm4, %v3065_v25  ;;  %2807 = vmatprep.subr.msk.mxu1 %vm137_vm8, %v3060_v23  ;;  %vm2056_vm4 = vcmask 130048  }
 0x4e2   :  { %2925 = vmatpush3.bf16.msk.msra.mxu0 %vm3234_vm9, %v3068_v48  ;;  %vm2059_vm9 = vcmask 195584  }
 0x4e3   :  { %2800 = vmatmul.mubr.msk.f32.vlgmr.msra.gmra.mrb[26].mxu1 %vm216_vm5, %v1177_v43  ;;  %2927 = vmatprep.subr.msk.bf16.mxu0 %vm3245_vm11, %v3068_v48 }
 0x4e4   :  { %2808 = vmatpush3.msk.msra.mxu1 %vm137_vm8, %v3060_v23  ;;  %2809 = vmatprep.mubr.msk.f32.mxu1 %vm216_vm5, %v1165_v18  ;;  %v2107_v18 = vld [vmem:[%s3710_s2 + $0x28] sm:$0xff] }
 0x4e6   :  { %2929 = vmatpush3.bf16.msk.msra.mxu0 %vm3245_vm11, %v3068_v48 }
 0x4e7   :  { %2810 = vmatmul.mubr.msk.f32.vlgmr.msra.gmra.mrb[28].mxu1 %vm216_vm5, %v1167_v28  ;;  %2931 = vmatprep.subr.msk.bf16.mxu0 %vm3263_vm14, %v3068_v48  ;;  %v2102_v28 = vld [vmem:[%s3710_s2] sm:$0xff] }
 0x4e8   :  { %2812 = vmatprep.mubr.msk.f32.mxu1 %vm216_vm5, %v1169_v35  ;;  %v2938_v16 = vpack.c.bf16 %v2103_v6, %v2102_v28  ;;  %v2236_v28 = vld [vmem:[%s3711_s3] sm:$0xff]  ;;  %v2237_v6 = vld [vmem:[%s3711_s3 + $0x8] sm:$0xff] }
 0x4e9   :  { %v2954_v7 = vpack.c.bf16 %v2237_v6, %v2236_v28 }
 0x4ea   :  { %2933 = vmatpush3.bf16.msk.msra.mxu0 %vm3263_vm14, %v3068_v48  ;;  %2939 = vmatprep.subr.bf16.mxu1 %v2938_v16 }
 0x4eb   :  { %2813 = vmatmul.mubr.msk.f32.gmra.mrb[30].mxu1 %vm216_vm5, %v1171_v8  ;;  %2935 = vmatprep.subr.msk.bf16.mxu0 %vm3279_vm2, %v3068_v48  ;;  %v2106_v8 = vld [vmem:[%s3710_s2 + $0x20] sm:$0xff] }
 0x4ec   :  { %2815 = vmatprep.mubr.msk.f32.mxu1 %vm216_vm5, %v1173_v44  ;;  %2941 = vmatpush3.bf16.msra.mxu1 %v2938_v16  ;;  %v2946_v19 = vpack.c.bf16 %v2107_v18, %v2106_v8  ;;  %v2238_v16 = vld [vmem:[%s3711_s3 + $0x10] sm:$0xff]  ;;  %v2327_v8 = vld [vmem:[%s3712_s4] sm:$0xff]  ;;  %v2328_v18 = vld [vmem:[%s3712_s4 + $0x8] sm:$0xff] }
 0x4ed   :  { %2943 = vmatprep.subr.bf16.mxu1 %v2942_v11  ;;  %v2962_v13 = vpack.c.bf16 %v2328_v18, %v2327_v8 }
 0x4ee   :  { %2937 = vmatpush3.bf16.msk.msra.mxu0 %vm3279_vm2, %v3068_v48 }
 0x4ef   :  { %2816 = vmatmul.mubr.msk.f32.gmra.mrb[32].mxu1 %vm216_vm5, %v1175_v39  ;;  %2963 = vmatprep.subr.bf16.mxu0 %v2962_v13 }
 0x4f0   :  { %2818 = vmatprep.mubr.msk.f32.mxu1 %vm216_vm5, %v1177_v43  ;;  %2945 = vmatpush3.bf16.msra.mxu1 %v2942_v11  ;;  %v2958_v11 = vpack.c.bf16 %v2239_v22, %v2238_v16 }
 0x4f1   :  { %2947 = vmatprep.subr.bf16.mxu1 %v2946_v19 }
 0x4f3   :  { %2819 = vmatmul.mubr.msk.f32.gmra.mrb[34].mxu1 %vm216_vm5, %v1179_v45 }
 0x4f4   :  { %2949 = vmatpush3.bf16.msra.mxu1 %v2946_v19  ;;  %v2329_v19 = vld [vmem:[%s3712_s4 + $0x10] sm:$0xff] }
 0x4f5   :  { %2951 = vmatprep.subr.bf16.mxu1 %v2950_v33 }
 0x4f8   :  { %2953 = vmatpush3.bf16.msra.mxu1 %v2950_v33  ;;  %v2966_v33 = vpack.c.bf16 %v2330_v32, %v2329_v19  ;;  %v2450_v19 = vsub.s32 6, %v3132_v10 }
 0x4f9   :  { %2955 = vmatprep.subr.bf16.mxu1 %v2954_v7 }
 0x5a6   :  { %v3540_v9 = vpop.f32.mrb[14].mxu0 }
 0x5a7   :  { %v2776_v12 = vpop.f32.mrb[15].mxu0 }
 0x5aa   :  { %v3542_v23 = vpop.f32.mrb[20].mxu1  ;;  %v1480_v25 = vpop.f32.mrb[16].mxu0 }
 0x5ab   :  { %v2771_v47 = vpop.f32.mrb[21].mxu1  ;;  %v2786_v49 = vpop.f32.mrb[17].mxu0 }
 0x5ae   :  { %v1404_v52 = vpop.f32.mrb[22].mxu1 }
 0x5af   :  { %v3544_v50 = vpop.f32.mrb[18].mxu0  ;;  %v2781_v40 = vpop.f32.mrb[23].mxu1 }
 0x5b0   :  { %v2796_v53 = vpop.f32.mrb[19].mxu0 }
 0x5b2   :  { %v3546_v48 = vpop.f32.mrb[24].mxu1 }
 0x5b3   :  { %v3548_v46 = vpop.f32.mrb[20].mxu0  ;;  %v2791_v51 = vpop.f32.mrb[25].mxu1 }
 0x5b4   :  { %v2806_v54 = vpop.f32.mrb[21].mxu0 }
 0x5b6   :  { %v3550_v55 = vpop.f32.mrb[26].mxu1 }
 0x5b7   :  { %v2801_v56 = vpop.f32.mrb[27].mxu1 }
 0x5ba   :  { %v2811_v57 = vpop.f32.mrb[28].mxu1 }
 0x5bb   :  { %v1854_v58 = vpop.f32.mrb[29].mxu1  ;;  %v1894_v60 = vmul.f32 %v2811_v57, %v3347_v5 }
 0x5bc   :  { %v1893_v59 = vmul.f32 %v1854_v58, %v3344_v4 }
 0x5be   :  { %v2814_v61 = vpop.f32.mrb[30].mxu1  ;;  %2837 = vmatprep.mubr.msk.f32.mxu0 %vm346_vm7, %v1893_v59  ;;  %v3624_v59 = vld [vmem:[%s3713_s5] sm:$0xff] }
 0x5bf   :  { %v1864_v27 = vpop.f32.mrb[31].mxu1  ;;  %2838 = vmatmul.mubr.msk.f32.vlgmr.msra.gmra.mrb[22].mxu0 %vm346_vm7, %v1894_v60  ;;  %v1896_v63 = vmul.f32 %v2814_v61, %v3365_v15  ;;  %v2451_v32 = vrot.slane %v3624_v59, %v2450_v19 }
 0x5c0   :  { %v1895_v62 = vmul.f32 %v1864_v27, %v3362_v14  ;;  %2965 = vmatpush3.bf16.msra.mxu0 %v2962_v13  ;;  %v2456_v13 = vsub.s32 7, %v3132_v10 }
 0x5c1   :  { %2967 = vmatprep.subr.bf16.mxu0 %v2966_v33 }
 0x5c2   :  { %v2817_v31 = vpop.f32.mrb[32].mxu1  ;;  %2840 = vmatprep.mubr.msk.f32.mxu0 %vm346_vm7, %v1895_v62 }
 0x5c3   :  { %v1874_v0 = vpop.f32.mrb[33].mxu1  ;;  %2841 = vmatmul.mubr.msk.f32.gmra.mrb[24].mxu0 %vm346_vm7, %v1896_v63  ;;  %v1898_v5 = vmul.f32 %v2817_v31, %v3379_v21  ;;  %v3034_v31 = vld [vmem:[%s3708_s0 + $0x8] sm:$0xff] }
 0x5c4   :  { %v1897_v4 = vmul.f32 %v1874_v0, %v3376_v20  ;;  %2969 = vmatpush3.bf16.msra.mxu0 %v2966_v33 }
 0x5c6   :  { %v2820_v26 = vpop.f32.mrb[34].mxu1  ;;  %2843 = vmatprep.mubr.msk.f32.mxu0 %vm346_vm7, %v1897_v4  ;;  %v3035_v4 = vld [vmem:[%s3708_s0] sm:$0xff] }
 0x5c7   :  { %v1884_v1 = vpop.f32.mrb[35].mxu1  ;;  %2844 = vmatmul.mubr.msk.f32.gmra.mrb[26].mxu0 %vm346_vm7, %v1898_v5  ;;  %v1900_v15 = vmul.f32 %v2820_v26, %v3395_v37 }
 0x5c8   :  { %v1899_v14 = vmul.f32 %v1884_v1, %v3392_v36 }
 0x5ca   :  { %2846 = vmatprep.mubr.msk.f32.mxu0 %vm346_vm7, %v1899_v14 }
 0x5cb   :  { %2847 = vmatmul.mubr.msk.f32.gmra.mrb[28].mxu0 %vm346_vm7, %v1900_v15 }
 0x692   :  { %v2839_v24 = vpop.f32.mrb[22].mxu0 }
 0x693   :  { %v1991_v29 = vpop.f32.mrb[23].mxu0 }
 0x696   :  { %v2842_v30 = vpop.f32.mrb[24].mxu0 }
 0x697   :  { %2066 = vrot.lane.b32.xlu1 %v2842_v30, %s3070_s16  ;;  %v2001_v20 = vpop.f32.mrb[25].mxu0 }
 0x698   :  { %2064 = vrot.lane.b32.xlu0 %v2001_v20, %s3070_s16 }
 0x69a   :  { %v2845_v21 = vpop.f32.mrb[26].mxu0 }
 0x69b   :  { %2074 = vrot.lane.b32.xlu1 %v2845_v21, %s3071_s17  ;;  %v2011_v3 = vpop.f32.mrb[27].mxu0 }
 0x69c   :  { %2072 = vrot.lane.b32.xlu0 %v2011_v3, %s3071_s17 }
 0x69e   :  { %v2848_v36 = vpop.f32.mrb[28].mxu0 }
 0x69f   :  { %2082 = vrot.lane.b32.xlu1 %v2848_v36, %s3072_s18  ;;  %v2021_v37 = vpop.f32.mrb[29].mxu0 }
 0x6a0   :  { %2080 = vrot.lane.b32.xlu0 %v2021_v37, %s3072_s18 }
 0x6a3   :  { %2034 = vrot.lane.b32.xlu1 %v1480_v25, %s3070_s16 }
 0x6a4   :  { %2032 = vrot.lane.b32.xlu0 %v1404_v52, %s3070_s16 }
 0x6a7   :  { %2042 = vrot.lane.b32.xlu1 %v3544_v50, %s3071_s17 }
 0x6a8   :  { %2040 = vrot.lane.b32.xlu0 %v3546_v48, %s3071_s17 }
 0x6ab   :  { %2050 = vrot.lane.b32.xlu1 %v3548_v46, %s3072_s18 }
 0x6ac   :  { %2048 = vrot.lane.b32.xlu0 %v3550_v55, %s3072_s18 }
 0x709   :  { %v2067_v34 = vpop.permute.xlu1 %2066 }
 0x70a   :  { %v2065_v35 = vpop.permute.xlu0 %2064  ;;  %v2087_v41 = vsel %vm216_vm5, %v2839_v24, %v2067_v34  ;;  %v2331_v34 = vld [vmem:[%s3712_s4 + $0x20] sm:$0xff] }
 0x70b   :  { %v2086_v42 = vsel %vm216_vm5, %v1991_v29, %v2065_v35  ;;  %v2332_v35 = vld [vmem:[%s3712_s4 + $0x28] sm:$0xff] }
 0x70d   :  { %v2075_v38 = vpop.permute.xlu1 %2074 }
 0x70e   :  { %v2073_v39 = vpop.permute.xlu0 %2072  ;;  %v2089_v2 = vsel %vm2056_vm4, %v2087_v41, %v2075_v38  ;;  %v2970_v38 = vpack.c.bf16 %v2332_v35, %v2331_v34 }
 0x70f   :  { %v2088_v17 = vsel %vm2056_vm4, %v2086_v42, %v2073_v39 }
 0x710   :  { %2971 = vmatprep.subr.bf16.mxu0 %v2970_v38 }
 0x711   :  { %v2083_v44 = vpop.permute.xlu1 %2082  ;;  %2973 = vmatpush3.bf16.msra.mxu0 %v2970_v38  ;;  %v2457_v38 = vrot.slane %v3624_v59, %v2456_v13 }
 0x712   :  { %v2081_v45 = vpop.permute.xlu0 %2080  ;;  %v2091_v43 = vsel %vm2059_vm9, %v2089_v2, %v2083_v44 }
 0x713   :  { %2096 = vrot.lane.b32.xlu1 %v2091_v43, %s3064_s13  ;;  %v2090_v12 = vsel %vm2059_vm9, %v2088_v17, %v2081_v45  ;;  %v2226_v45 = vsub.s32 4, %v3132_v10  ;;  %v2232_v43 = vsub.s32 5, %v3132_v10 }
 0x714   :  { %2094 = vrot.lane.b32.xlu0 %v2090_v12, %s3064_s13 }
 0x715   :  { %v2035_v25 = vpop.permute.xlu1 %2034  ;;  %v2227_v12 = vrot.slane %v3624_v59, %v2226_v45 }
 0x716   :  { %v2033_v47 = vpop.permute.xlu0 %2032  ;;  %v2055_v49 = vsel %vm216_vm5, %v3540_v9, %v2035_v25 }
 0x717   :  { %v2054_v50 = vsel %vm216_vm5, %v3542_v23, %v2033_v47  ;;  %v2112_v23 = vsub.s32 2, %v3132_v10 }
 0x719   :  { %v2043_v52 = vpop.permute.xlu1 %2042  ;;  %v2113_v60 = vrot.slane %v3624_v59, %v2112_v23 }
 0x71a   :  { %v2058_v40 = vsel %vm2056_vm4, %v2055_v49, %v2043_v52  ;;  %v2041_v53 = vpop.permute.xlu0 %2040  ;;  %v2233_v49 = vrot.slane %v3624_v59, %v2232_v43 }
 0x71b   :  { %v2057_v48 = vsel %vm2056_vm4, %v2054_v50, %v2041_v53 }
 0x71d   :  { %v2051_v46 = vpop.permute.xlu1 %2050 }
 0x71e   :  { %v2061_v51 = vsel %vm2059_vm9, %v2058_v40, %v2051_v46  ;;  %v2049_v54 = vpop.permute.xlu0 %2048 }
 0x71f   :  { %v2060_v55 = vsel %vm2059_vm9, %v2057_v48, %v2049_v54  ;;  %v2334_v54 = vld [vmem:[%s3712_s4 + $0x38] sm:$0xff] }
 0x785   :  { %v2097_v56 = vpop.permute.xlu1 %2096 }
 0x786   :  { %v2095_v57 = vpop.permute.xlu0 %2094  ;;  %v2101_v9 = vsel %vm35_vm0, %v2061_v51, %v2097_v56  ;;  %v2333_v51 = vld [vmem:[%s3712_s4 + $0x30] sm:$0xff]  ;;  %v2242_v56 = vsub.s32 1, %v3132_v10  ;;  %s3073_s4 = smov [#allocation2]  }
 0x787   :  { %v2100_v58 = vsel %vm35_vm0, %v2060_v55, %v2095_v57  ;;  %v2974_v55 = vpack.c.bf16 %v2334_v54, %v2333_v51  ;;  %s2467_s11 = sshll.u32 %s3073_s4, 4  ;;  %s2468_s11 = int_to_ptr.vmem [resolvable:$true] %s2467_s11 }
 0x788   :  { %2865 = vmatprep.mubr.msk.f32.mxu1 %vm346_vm7, %v2100_v58  ;;  %v2243_v57 = vrot.slane %v3624_v59, %v2242_v56  ;;  %s3036_s12 = scalar_lea.vmem %s2468_s11, 256  ;;  %p3041_p1 = scmp.lt.s32.totalorder %s2468_s11, %s2468_s11 }
 0x789   :  { %2866 = vmatmul.mubr.msk.f32.vlgmr.msra.gmra.mrb[36].mxu1 %vm346_vm7, %v2101_v9  ;;  %2975 = vmatprep.subr.bf16.mxu0 %v2974_v55  ;;  %p3037_p0 = scmp.ne.s32.totalorder %s2468_s11, %s3036_s12  ;;  %p3042_p2 = scmp.lt.s32.totalorder %s3036_s12, %s3036_s12 }
 0x78a   :  { %2957 = vmatpush3.bf16.msra.mxu1 %v2954_v7  ;;  %2977 = vmatpush3.bf16.msra.mxu0 %v2974_v55 }
 0x78b   :  { %2959 = vmatprep.subr.bf16.mxu1 %v2958_v11  ;;  %p3043_p3 = por %p3042_p2, %p3041_p1 }
 0x78d   :  { %p3044_p4 = pnand %p3043_p3, %p3037_p0 }
 0x78e   :  { %2961 = vmatpush3.bf16.msra.mxu1 %v2958_v11 }
 0x85c   :  { %v2867_v61 = vpop.f32.mrb[36].mxu1 }
 0x85d   :  { %v2192_v27 = vadd.f32 %v2867_v61, %v2113_v60  ;;  %v2186_v62 = vpop.f32.mrb[37].mxu1 }
 0x85e   :  { %v2187_v63 = vadd.f32 %v2186_v62, %v2113_v60  ;;  %v2337_v62 = vsub.s32 3, %v3132_v10 }
 0x85f   :  { %v2196_v0 = vadd.f32 %v3034_v31, %v2192_v27 }
 0x860   :  { %v2195_v5 = vadd.f32 %v3035_v4, %v2187_v63  ;;  %v2338_v63 = vrot.slane %v3624_v59, %v2337_v62 }
 0x861   :  { %v2200_v26 = vsel %vm35_vm0, %v2196_v0, 0.0 }
 0x862   :  { %2201 = vadd.xlane.f32.xlu1 %v2200_v26  ;;  %v2197_v1 = vsel %vm35_vm0, %v2195_v5, 0.0 }
 0x863   :  { %2198 = vadd.xlane.f32.xlu0 %v2197_v1 }
 0x8ef   :  { %v2202_v14 = vpop.xlane.xlu1 %2201 }
 0x8f0   :  { %v2205_v15 = vmul.f32 0.03125, %v2202_v14  ;;  %v2199_v24 = vpop.xlane.xlu0 %2198 }
 0x8f1   :  { %v2204_v29 = vmul.f32 0.03125, %v2199_v24 }
 0x8f2   :  { %v2207_v30 = vsub.f32 %v2196_v0, %v2205_v15 }
 0x8f3   :  { %v2206_v20 = vsub.f32 %v2195_v5, %v2204_v29 }
 0x8f4   :  { %v2209_v36 = vmul.f32 %v2207_v30, %v2207_v30 }
 0x8f5   :  { %v2208_v21 = vmul.f32 %v2206_v20, %v2206_v20 }
 0x8f6   :  { %v2213_v37 = vsel %vm35_vm0, %v2209_v36, 0.0 }
 0x8f7   :  { %v2210_v3 = vsel %vm35_vm0, %v2208_v21, 0.0 }
 0x8f8   :  { %2211 = vadd.xlane.f32.xlu0 %v2210_v3 }
 0x8fc   :  { %2214 = vadd.xlane.f32.xlu0 %v2213_v37 }
 0x985   :  { %v2212_v39 = vpop.xlane.xlu0 %2211 }
 0x986   :  { %v2216_v41 = vmul.f32 0.03125, %v2212_v39 }
 0x988   :  { %v2218_v42 = vadd.f32 1e-05, %v2216_v41 }
 0x989   :  { %v2215_v2 = vpop.xlane.xlu0 %2214 }
 0x98a   :  { %3025 = vrsqrt.f32 %v2218_v42  ;;  %v2217_v44 = vmul.f32 0.03125, %v2215_v2 }
 0x98c   :  { %v2219_v17 = vadd.f32 1e-05, %v2217_v44 }
 0x98e   :  { %3027 = vrsqrt.f32 %v2219_v17 }
 0x994   :  { %v3026_v25 = vpop.eup %3025 }
 0x995   :  { %v2222_v47 = vmul.f32 %v3026_v25, %v2206_v20 }
 0x997   :  { %v2228_v52 = vmul.f32 %v2227_v12, %v2222_v47 }
 0x998   :  { %v3028_v50 = vpop.eup %3027 }
 0x999   :  { %v2223_v40 = vmul.f32 %v3028_v50, %v2207_v30  ;;  %v2234_v53 = vadd.f32 %v2233_v49, %v2228_v52 }
 0x99b   :  { %v2229_v48 = vmul.f32 %v2227_v12, %v2223_v40  ;;  %2876 = vmatprep.mubr.msk.f32.mxu1 %vm35_vm0, %v2234_v53 }
 0x99d   :  { %v2235_v46 = vadd.f32 %v2233_v49, %v2229_v48 }
 0x99f   :  { %2877 = vmatmul.mubr.msk.f32.vlgmr.msra.gmra.mrb[38].mxu1 %vm35_vm0, %v2235_v46 }
 0xa72   :  { %v2878_v58 = vpop.f32.mrb[38].mxu1 }
 0xa73   :  { %v2322_v9 = vadd.f32 %v2878_v58, %v2243_v57  ;;  %v2316_v23 = vpop.f32.mrb[39].mxu1 }
 0xa74   :  { %v2317_v60 = vadd.f32 %v2316_v23, %v2243_v57 }
 0xa75   :  { %v2326_v27 = vmax.f32 %v2322_v9, 0.0 }
 0xa76   :  { %v2325_v61 = vmax.f32 %v2317_v60, 0.0 }
 0xa78   :  { %2895 = vmatprep.mubr.msk.f32.mxu0 %vm346_vm7, %v2325_v61 }
 0xa79   :  { %2896 = vmatmul.mubr.msk.f32.vlgmr.msra.gmra.mrb[30].mxu0 %vm346_vm7, %v2326_v27 }
 0xb4c   :  { %v2897_v31 = vpop.f32.mrb[30].mxu0 }
 0xb4d   :  { %v2417_v0 = vadd.f32 %v2897_v31, %v2338_v63  ;;  %v2411_v4 = vpop.f32.mrb[31].mxu0 }
 0xb4e   :  { %v2412_v5 = vadd.f32 %v2411_v4, %v2338_v63 }
 0xb4f   :  { %v2421_v26 = vadd.f32 %v2417_v0, %v2235_v46 }
 0xb50   :  { %v2420_v1 = vadd.f32 %v2412_v5, %v2234_v53 }
 0xb51   :  { %v2425_v14 = vsel %vm35_vm0, %v2421_v26, 0.0 }
 0xb52   :  { %2426 = vadd.xlane.f32.xlu0 %v2425_v14  ;;  %v2422_v15 = vsel %vm35_vm0, %v2420_v1, 0.0 }
 0xb53   :  { %2423 = vadd.xlane.f32.xlu1 %v2422_v15 }
 0xbdf   :  { %v2427_v24 = vpop.xlane.xlu0 %2426 }
 0xbe0   :  { %v2429_v29 = vmul.f32 0.03125, %v2427_v24  ;;  %v2424_v30 = vpop.xlane.xlu1 %2423 }
 0xbe1   :  { %v2428_v20 = vmul.f32 0.03125, %v2424_v30 }
 0xbe2   :  { %v2431_v21 = vsub.f32 %v2421_v26, %v2429_v29 }
 0xbe3   :  { %v2430_v3 = vsub.f32 %v2420_v1, %v2428_v20 }
 0xbe4   :  { %v2433_v36 = vmul.f32 %v2431_v21, %v2431_v21 }
 0xbe5   :  { %v2432_v37 = vmul.f32 %v2430_v3, %v2430_v3 }
 0xbe6   :  { %v2437_v28 = vsel %vm35_vm0, %v2433_v36, 0.0 }
 0xbe7   :  { %2438 = vadd.xlane.f32.xlu0 %v2437_v28  ;;  %v2434_v6 = vsel %vm35_vm0, %v2432_v37, 0.0 }
 0xbe8   :  { %2435 = vadd.xlane.f32.xlu1 %v2434_v6 }
 0xc74   :  { %v2439_v7 = vpop.xlane.xlu0 %2438 }
 0xc75   :  { %v2441_v16 = vmul.f32 0.03125, %v2439_v7  ;;  %v2436_v22 = vpop.xlane.xlu1 %2435 }
 0xc76   :  { %v2440_v11 = vmul.f32 0.03125, %v2436_v22 }
 0xc77   :  { %v2443_v8 = vadd.f32 1e-05, %v2441_v16 }
 0xc78   :  { %v2442_v18 = vadd.f32 1e-05, %v2440_v11 }
 0xc79   :  { %3029 = vrsqrt.f32 %v2443_v8 }
 0xc7a   :  { %3031 = vrsqrt.f32 %v2442_v18 }
 0xc83   :  { %v3030_v33 = vpop.eup %3029 }
 0xc84   :  { %v3032_v34 = vpop.eup %3031  ;;  %v2447_v35 = vmul.f32 %v3030_v33, %v2431_v21 }
 0xc85   :  { %v2446_v39 = vmul.f32 %v3032_v34, %v2430_v3 }
 0xc86   :  { %v2453_v41 = vmul.f32 %v2451_v32, %v2447_v35 }
 0xc87   :  { %v2452_v42 = vmul.f32 %v2451_v32, %v2446_v39 }
 0xc88   :  { %v2459_v2 = vadd.f32 %v2457_v38, %v2453_v41 }
 0xc89   :  { %v2458_v44 = vadd.f32 %v2457_v38, %v2452_v42 }
 0xc8a   :  { %2461 = vst.msk [vmem:[#allocation2 + $0x8] sm:$0xff] %vm35_vm0, %v2459_v2 }
 0xc8b   :  { %2460 = vst.msk [vmem:[#allocation2] sm:$0xff] %vm35_vm0, %v2458_v44 }
 0xc8c   :  { %3047 = shalt.err (!%p3044_p4)
}
 0xc8d   :  { %s3048_s0 = scalar_lea.hbm %s3714_s6, 256 }
 0xc8e   :  { %p3049_p5 = scmp.ne.s32.totalorder %s3714_s6, %s3048_s0  ;;  %p3052_p6 = scmp.lt.u32.totalorder %s3048_s0, %s3714_s6 }
 0xc90   :  { %p3054_p7 = pnand %p3052_p6, %p3049_p5 }
 0xc92   :  { %3057 = shalt.err (!%p3054_p7)
}
 0xc93   :  { %s3074_s19 = smov 128  }
 0xc94   :  { %2473 = dma.vmem_to_hbm [thread:$0]  %s2468_s11, 256, %s3714_s6, [#allocation3], %s3074_s19, %s3074_s19, %s3070_s16  }
 0xc95   :  { %3058 = dma.done.wait [#allocation3], 256  }
 0xc96   :  { %3059 = vsyncadd [#allocation3], 4294967040 }
 0xc97   :  { %2477 = vsyncpa [#allocation3], 1 }

</bundles_post_ra>
